<compile_context>
chip_gen: v6e
topology: v6e:2x2x1
jax: 0.10.0
libtpu: 0.0.40
codegen_flags: <defaults>
</compile_context>

<pallas_src>
import math
import functools

import jax
import jax.numpy as jnp
from jax.experimental import pallas as pl
from jax.experimental.pallas import tpu as pltpu

# Keep the pure-JAX reference (and in-kernel dots) at full f32 matmul precision so the
# correctness check is not polluted by XLA's default bf16 matmul passes.
jax.config.update("jax_default_matmul_precision", "highest")


# ----------------------------- tiling helper ---------------------------------

def _pick_tile(dim: int, unit: int, cap: int) -> int:
    """Largest tile <= cap that divides `dim` and is a multiple of `unit`.
    Falls back to the full dim (always a legal TPU block shape)."""
    if dim <= cap:
        return dim
    t = (cap // unit) * unit
    while t >= unit:
        if dim % t == 0:
            return t
        t -= unit
    return dim


# ------------------------------- LayerNorm -----------------------------------

def _make_layernorm_kernel(eps: float, d: int):
    def kernel(x_ref, g_ref, b_ref, o_ref):
        x = x_ref[...].astype(jnp.float32)
        mean = jnp.mean(x, axis=-1, keepdims=True)
        c = x - mean
        # torch .std() is unbiased (ddof=1); eps is added to std (not variance).
        var = jnp.sum(c * c, axis=-1, keepdims=True) * (1.0 / (d - 1))
        y = (g_ref[...].astype(jnp.float32) * c / (jnp.sqrt(var) + eps)
             + b_ref[...].astype(jnp.float32))
        o_ref[...] = y.astype(o_ref.dtype)
    return kernel


def layer_norm(x, gamma, beta, *, eps: float = 1e-6):
    orig_shape = x.shape
    d = orig_shape[-1]
    m = math.prod(orig_shape[:-1])
    x2 = x.reshape(m, d)
    g2 = gamma.reshape(1, d)
    b2 = beta.reshape(1, d)

    tm = _pick_tile(m, 8, 512)
    out = pl.pallas_call(
        _make_layernorm_kernel(eps, d),
        out_shape=jax.ShapeDtypeStruct((m, d), x.dtype),
        grid=(m // tm,),
        in_specs=[
            pl.BlockSpec((tm, d), lambda i: (i, 0)),
            pl.BlockSpec((1, d), lambda i: (0, 0)),
            pl.BlockSpec((1, d), lambda i: (0, 0)),
        ],
        out_specs=pl.BlockSpec((tm, d), lambda i: (i, 0)),
        compiler_params=pltpu.CompilerParams(dimension_semantics=("parallel",)),
    )(x2, g2, b2)
    return out.reshape(orig_shape)


# ------------------------- Linear (+bias, +ReLU, +residual) -------------------

def _make_linear_kernel(activation, has_residual):
    def kernel(*refs):
        if has_residual:
            x_ref, w_ref, b_ref, r_ref, o_ref, acc_ref = refs
        else:
            x_ref, w_ref, b_ref, o_ref, acc_ref = refs

        k = pl.program_id(2)

        @pl.when(k == 0)
        def _init():
            acc_ref[...] = jnp.zeros_like(acc_ref)

        acc_ref[...] += jnp.dot(x_ref[...].astype(jnp.float32),
                                w_ref[...].astype(jnp.float32),
                                preferred_element_type=jnp.float32)

        @pl.when(k == pl.num_programs(2) - 1)
        def _finish():
            y = acc_ref[...] + b_ref[...].astype(jnp.float32)
            if activation == "relu":
                y = jnp.maximum(y, 0.0)
            if has_residual:
                y = y + r_ref[...].astype(jnp.float32)
            o_ref[...] = y.astype(o_ref.dtype)

    return kernel


def linear(x, w, b, *, residual=None, activation=None):
    """y = activation(x @ w + b) [+ residual], tiled MXU matmul with fused epilogue."""
    orig_shape = x.shape
    K = orig_shape[-1]
    M = math.prod(orig_shape[:-1])
    N = w.shape[1]
    x2 = x.reshape(M, K)
    b2 = b.reshape(1, N)

    tm = _pick_tile(M, 8, 256)
    tn = _pick_tile(N, 128, 256)
    tk = _pick_tile(K, 128, 512)
    grid = (M // tm, N // tn, K // tk)   # reduction axis (K) last

    in_specs = [
        pl.BlockSpec((tm, tk), lambda i, j, k: (i, k)),
        pl.BlockSpec((tk, tn), lambda i, j, k: (k, j)),
        pl.BlockSpec((1, tn), lambda i, j, k: (0, j)),
    ]
    inputs = [x2, w, b2]
    if residual is not None:
        in_specs.append(pl.BlockSpec((tm, tn), lambda i, j, k: (i, j)))
        inputs.append(residual.reshape(M, N))

    out = pl.pallas_call(
        _make_linear_kernel(activation, residual is not None),
        out_shape=jax.ShapeDtypeStruct((M, N), x.dtype),
        grid=grid,
        in_specs=in_specs,
        out_specs=pl.BlockSpec((tm, tn), lambda i, j, k: (i, j)),
        scratch_shapes=[pltpu.VMEM((tm, tn), jnp.float32)],
        compiler_params=pltpu.CompilerParams(
            dimension_semantics=("parallel", "parallel", "arbitrary")),
    )(*inputs)
    return out.reshape(orig_shape[:-1] + (N,))


# ----------------------------- Attention core ---------------------------------

def _make_attention_kernel(scale: float, has_mask: bool):
    def kernel(*refs):
        if has_mask:
            q_ref, k_ref, v_ref, m_ref, o_ref = refs
        else:
            q_ref, k_ref, v_ref, o_ref = refs

        q = q_ref[0].astype(jnp.float32)      # (S_q, dk)
        kk = k_ref[0].astype(jnp.float32)     # (S_k, dk)
        v = v_ref[0].astype(jnp.float32)      # (S_k, dk)

        # scores = Q @ K^T / sqrt(dk)
        s = jax.lax.dot_general(q, kk, (((1,), (1,)), ((), ())),
                                preferred_element_type=jnp.float32) * scale
        if has_mask:
            s = jnp.where(m_ref[0] == 0, jnp.float32(-1e9), s)   # (1, S_k) broadcast

        # numerically stable softmax over keys
        s = s - jnp.max(s, axis=-1, keepdims=True)
        p = jnp.exp(s)
        p = p / jnp.sum(p, axis=-1, keepdims=True)

        o = jnp.dot(p, v, preferred_element_type=jnp.float32)
        o_ref[0] = o.astype(o_ref.dtype)

    return kernel


def multi_head_attention(q, k, v, mask, *, n_heads: int):
    B, S, D = q.shape
    dk = D // n_heads
    scale = 1.0 / math.sqrt(dk)

    def split(t):  # (B, S, D) -> (B*H, S, dk)
        return t.reshape(B, S, n_heads, dk).transpose(0, 2, 1, 3).reshape(B * n_heads, S, dk)

    qh, kh, vh = split(q), split(k), split(v)

    has_mask = mask is not None
    in_specs = [pl.BlockSpec((1, S, dk), lambda i: (i, 0, 0)) for _ in range(3)]
    inputs = [qh, kh, vh]
    if has_mask:
        m = mask.reshape(B, 1, S).astype(jnp.int32)   # padding mask over key positions
        in_specs.append(pl.BlockSpec((1, 1, S), lambda i: (i // n_heads, 0, 0)))
        inputs.append(m)

    out = pl.pallas_call(
        _make_attention_kernel(scale, has_mask),
        out_shape=jax.ShapeDtypeStruct((B * n_heads, S, dk), q.dtype),
        grid=(B * n_heads,),
        in_specs=in_specs,
        out_specs=pl.BlockSpec((1, S, dk), lambda i: (i, 0, 0)),
        compiler_params=pltpu.CompilerParams(dimension_semantics=("parallel",)),
    )(*inputs)

    # merge heads: (B*H, S, dk) -> (B, S, D)
    return out.reshape(B, n_heads, S, dk).transpose(0, 2, 1, 3).reshape(B, S, D)


# ------------------------------ Encoder forward --------------------------------

def encoder_forward(src, params, src_mask=None, *, n_heads: int):
    """Eval-mode forward of the PyTorch Encoder: pre-LN blocks + final LayerNorm."""
    x = src
    for p in params["layers"]:
        # --- self-attention sub-layer (pre-norm, residual) ---
        h = layer_norm(x, p["norm1_gamma"], p["norm1_beta"])
        q = linear(h, p["wq"], p["bq"])
        k = linear(h, p["wk"], p["bk"])
        v = linear(h, p["wv"], p["bv"])
        a = multi_head_attention(q, k, v, src_mask, n_heads=n_heads)
        x = linear(a, p["wo"], p["bo"], residual=x)          # concat proj + residual fused
        # --- feed-forward sub-layer (pre-norm, residual) ---
        h = layer_norm(x, p["norm2_gamma"], p["norm2_beta"])
        f = linear(h, p["w1"], p["b1"], activation="relu")    # ff1 + ReLU fused
        x = linear(f, p["w2"], p["b2"], residual=x)           # ff2 + residual fused
    return layer_norm(x, params["norm_gamma"], params["norm_beta"])


# ------------------------------ pure-JAX reference -----------------------------

def _ref_layernorm(x, g, b, eps=1e-6):
    mean = x.mean(-1, keepdims=True)
    var = jnp.sum((x - mean) ** 2, -1, keepdims=True) / (x.shape[-1] - 1)
    return g * (x - mean) / (jnp.sqrt(var) + eps) + b


def _ref_mha(x, p, mask, n_heads):
    B, S, D = x.shape
    dk = D // n_heads
    q = x @ p["wq"] + p["bq"]
    k = x @ p["wk"] + p["bk"]
    v = x @ p["wv"] + p["bv"]

    def split(t):
        return t.reshape(B, S, n_heads, dk).transpose(0, 2, 1, 3)

    qh, kh, vh = split(q), split(k), split(v)
    scores = jnp.einsum("bhqd,bhkd->bhqk", qh, kh) / math.sqrt(dk)
    if mask is not None:
        scores = jnp.where(mask.reshape(B, 1, 1, S) == 0, -1e9, scores)
    w = jax.nn.softmax(scores, axis=-1)
    o = jnp.einsum("bhqk,bhkd->bhqd", w, vh)
    o = o.transpose(0, 2, 1, 3).reshape(B, S, D)
    return o @ p["wo"] + p["bo"]


def encoder_reference(src, params, mask, n_heads):
    x = src
    for p in params["layers"]:
        h = _ref_layernorm(x, p["norm1_gamma"], p["norm1_beta"])
        x = x + _ref_mha(h, p, mask, n_heads)
        h = _ref_layernorm(x, p["norm2_gamma"], p["norm2_beta"])
        x = x + (jnp.maximum(h @ p["w1"] + p["b1"], 0.0) @ p["w2"] + p["b2"])
    return _ref_layernorm(x, params["norm_gamma"], params["norm_beta"])


# ------------------------------- params init -----------------------------------

def init_encoder_params(key, d_model, n_layers, d_ff):
    def dense(k, fan_in, fan_out):
        kw, kb = jax.random.split(k)
        w = jax.random.normal(kw, (fan_in, fan_out), jnp.float32) * (1.0 / math.sqrt(fan_in))
        b = jax.random.normal(kb, (fan_out,), jnp.float32) * 0.01
        return w, b

    layers = []
    for _ in range(n_layers):
        key, *ks = jax.random.split(key, 7)
        wq, bq = dense(ks[0], d_model, d_model)
        wk, bk = dense(ks[1], d_model, d_model)
        wv, bv = dense(ks[2], d_model, d_model)
        wo, bo = dense(ks[3], d_model, d_model)
        w1, b1 = dense(ks[4], d_model, d_ff)
        w2, b2 = dense(ks[5], d_ff, d_model)
        layers.append(dict(
            norm1_gamma=jnp.ones((d_model,), jnp.float32),
            norm1_beta=jnp.zeros((d_model,), jnp.float32),
            norm2_gamma=jnp.ones((d_model,), jnp.float32),
            norm2_beta=jnp.zeros((d_model,), jnp.float32),
            wq=wq, bq=bq, wk=wk, bk=bk, wv=wv, bv=bv, wo=wo, bo=bo,
            w1=w1, b1=b1, w2=w2, b2=b2,
        ))
    return dict(layers=layers,
                norm_gamma=jnp.ones((d_model,), jnp.float32),
                norm_beta=jnp.zeros((d_model,), jnp.float32))


# ----------------------------------- main ---------------------------------------

if __name__ == "__main__":
    B, S, D_MODEL, N_HEADS, D_FF, N_LAYERS = 2, 8, 32, 4, 64, 2

    root = jax.random.PRNGKey(0)
    k_x, k_p = jax.random.split(root)
    src = jax.random.normal(k_x, (B, S, D_MODEL), dtype=jnp.float32)
    params = init_encoder_params(k_p, D_MODEL, N_LAYERS, D_FF)

    fwd = jax.jit(functools.partial(encoder_forward, n_heads=N_HEADS))

    # 1) forward without mask (src_mask defaults to None in the torch module)
    out = jax.block_until_ready(fwd(src, params))
    ref = encoder_reference(src, params, None, N_HEADS)
    assert out.shape == (B, S, D_MODEL)
    err = float(jnp.max(jnp.abs(out - ref)))
    assert jnp.allclose(out, ref, atol=2e-3, rtol=2e-3), f"max abs err {err}"

    # 2) forward with a padding mask (last two key positions of batch 1 masked out)
    src_mask = jnp.ones((B, 1, S), dtype=jnp.int32).at[1, 0, S - 2:].set(0)
    out_m = jax.block_until_ready(fwd(src, params, src_mask))
    ref_m = encoder_reference(src, params, src_mask, N_HEADS)
    err_m = float(jnp.max(jnp.abs(out_m - ref_m)))
    assert jnp.allclose(out_m, ref_m, atol=2e-3, rtol=2e-3), f"max abs err (masked) {err_m}"

    print("KERNEL_OK")
</pallas_src>

<mosaic_0001>
module attributes {stable_mosaic.version = 11 : i64} {
  func.func @kernel(%arg0: i32, %arg1: memref<16x32xf32, #tpu.memory_space<vmem>>, %arg2: memref<1x32xf32, #tpu.memory_space<vmem>>, %arg3: memref<1x32xf32, #tpu.memory_space<vmem>>, %arg4: memref<16x32xf32, #tpu.memory_space<vmem>>) attributes {dimension_semantics = [#tpu.dimension_semantics<parallel>], iteration_bounds = array<i64: 1>, scalar_prefetch = 0 : i64, scratch_operands = 0 : i64, tpu.core_type = #tpu.core_type<tc>, window_params = [{transform_indices = @transform_0, window_bounds = array<i64: 16, 32>}, {pipeline_mode = #tpu.pipeline_mode<synchronous>, transform_indices = @transform_1, window_bounds = array<i64: 1, 32>}, {pipeline_mode = #tpu.pipeline_mode<synchronous>, transform_indices = @transform_2, window_bounds = array<i64: 1, 32>}, {transform_indices = @transform_3, window_bounds = array<i64: 16, 32>}]} {
    %c0 = arith.constant 0 : index
    %c0_0 = arith.constant 0 : index
    %0 = vector.load %arg1[%c0, %c0_0] : memref<16x32xf32, #tpu.memory_space<vmem>>, vector<16x32xf32>
    %cst = arith.constant dense<0.000000e+00> : vector<16xf32>
    %1 = vector.multi_reduction <add>, %0, %cst [1] : vector<16x32xf32> to vector<16xf32>
    %2 = vector.shape_cast %1 : vector<16xf32> to vector<16x1xf32>
    %cst_1 = arith.constant 3.200000e+01 : f32
    %3 = vector.broadcast %cst_1 : f32 to vector<16x1xf32>
    %4 = arith.divf %2, %3 : vector<16x1xf32>
    %5 = vector.broadcast %4 : vector<16x1xf32> to vector<16x32xf32>
    %6 = arith.subf %0, %5 : vector<16x32xf32>
    %7 = arith.mulf %6, %6 : vector<16x32xf32>
    %cst_2 = arith.constant dense<0.000000e+00> : vector<16xf32>
    %8 = vector.multi_reduction <add>, %7, %cst_2 [1] : vector<16x32xf32> to vector<16xf32>
    %9 = vector.shape_cast %8 : vector<16xf32> to vector<16x1xf32>
    %cst_3 = arith.constant 0.0322580636 : f32
    %10 = vector.broadcast %cst_3 : f32 to vector<16x1xf32>
    %11 = arith.mulf %9, %10 : vector<16x1xf32>
    %c0_4 = arith.constant 0 : index
    %c0_5 = arith.constant 0 : index
    %12 = vector.load %arg2[%c0_4, %c0_5] : memref<1x32xf32, #tpu.memory_space<vmem>>, vector<1x32xf32>
    %13 = vector.broadcast %12 : vector<1x32xf32> to vector<16x32xf32>
    %14 = arith.mulf %13, %6 : vector<16x32xf32>
    %15 = math.sqrt %11 : vector<16x1xf32>
    %cst_6 = arith.constant 9.99999997E-7 : f32
    %16 = vector.broadcast %cst_6 : f32 to vector<16x1xf32>
    %17 = arith.addf %15, %16 : vector<16x1xf32>
    %18 = vector.broadcast %17 : vector<16x1xf32> to vector<16x32xf32>
    %19 = arith.divf %14, %18 : vector<16x32xf32>
    %c0_7 = arith.constant 0 : index
    %c0_8 = arith.constant 0 : index
    %20 = vector.load %arg3[%c0_7, %c0_8] : memref<1x32xf32, #tpu.memory_space<vmem>>, vector<1x32xf32>
    %21 = vector.broadcast %20 : vector<1x32xf32> to vector<16x32xf32>
    %22 = arith.addf %19, %21 : vector<16x32xf32>
    %c0_9 = arith.constant 0 : index
    %c0_10 = arith.constant 0 : index
    %23 = vector.load %arg4[%c0_9, %c0_10] : memref<16x32xf32, #tpu.memory_space<vmem>>, vector<16x32xf32>
    tpu.vector_store %arg4[%c0_9, %c0_10], %22 {strides = array<i32>} : memref<16x32xf32, #tpu.memory_space<vmem>>, vector<16x32xf32>,
    return
  }
  func.func @transform_0(%arg0: i32) -> (i32, i32) {
    %c0_i32 = arith.constant 0 : i32
    %c0_i32_0 = arith.constant 0 : i32
    return %arg0, %c0_i32 : i32, i32
  }
  func.func @transform_1(%arg0: i32) -> (i32, i32) {
    %c0_i32 = arith.constant 0 : i32
    %c0_i32_0 = arith.constant 0 : i32
    %c0_i32_1 = arith.constant 0 : i32
    return %c0_i32, %c0_i32_0 : i32, i32
  }
  func.func @transform_2(%arg0: i32) -> (i32, i32) {
    %c0_i32 = arith.constant 0 : i32
    %c0_i32_0 = arith.constant 0 : i32
    %c0_i32_1 = arith.constant 0 : i32
    return %c0_i32, %c0_i32_0 : i32, i32
  }
  func.func @transform_3(%arg0: i32) -> (i32, i32) {
    %c0_i32 = arith.constant 0 : i32
    %c0_i32_0 = arith.constant 0 : i32
    return %arg0, %c0_i32 : i32, i32
  }
}

module attributes {stable_mosaic.version = 11 : i64} {
  func.func @kernel(%arg0: i32, %arg1: i32, %arg2: i32, %arg3: memref<16x32xf32, #tpu.memory_space<vmem>>, %arg4: memref<32x32xf32, #tpu.memory_space<vmem>>, %arg5: memref<1x32xf32, #tpu.memory_space<vmem>>, %arg6: memref<16x32xf32, #tpu.memory_space<vmem>>, %arg7: memref<16x32xf32, #tpu.memory_space<vmem>>) attributes {dimension_semantics = [#tpu.dimension_semantics<parallel>, #tpu.dimension_semantics<parallel>, #tpu.dimension_semantics<arbitrary>], iteration_bounds = array<i64: 1, 1, 1>, scalar_prefetch = 0 : i64, scratch_operands = 1 : i64, tpu.core_type = #tpu.core_type<tc>, window_params = [{transform_indices = @transform_0, window_bounds = array<i64: 16, 32>}, {transform_indices = @transform_1, window_bounds = array<i64: 32, 32>}, {transform_indices = @transform_2, window_bounds = array<i64: 1, 32>}, {transform_indices = @transform_3, window_bounds = array<i64: 16, 32>}]} {
    %c0_i32 = arith.constant 0 : i32
    %0 = arith.cmpi eq, %arg2, %c0_i32 : i32
    %1 = arith.extui %0 : i1 to i32
    %c0_i32_0 = arith.constant 0 : i32
    %2 = arith.cmpi ne, %1, %c0_i32_0 : i32
    scf.if %2 {
      %cst_10 = arith.constant 0.000000e+00 : f32
      %12 = vector.broadcast %cst_10 : f32 to vector<16x32xf32>
      %c0_11 = arith.constant 0 : index
      %c0_12 = arith.constant 0 : index
      %13 = vector.load %arg7[%c0_11, %c0_12] : memref<16x32xf32, #tpu.memory_space<vmem>>, vector<16x32xf32>
      tpu.vector_store %arg7[%c0_11, %c0_12], %12 {strides = array<i32>} : memref<16x32xf32, #tpu.memory_space<vmem>>, vector<16x32xf32>,
    } else {
    }
    %c0 = arith.constant 0 : index
    %c0_1 = arith.constant 0 : index
    %3 = vector.load %arg7[%c0, %c0_1] : memref<16x32xf32, #tpu.memory_space<vmem>>, vector<16x32xf32>
    %c0_2 = arith.constant 0 : index
    %c0_3 = arith.constant 0 : index
    %4 = vector.load %arg3[%c0_2, %c0_3] : memref<16x32xf32, #tpu.memory_space<vmem>>, vector<16x32xf32>
    %c0_4 = arith.constant 0 : index
    %c0_5 = arith.constant 0 : index
    %5 = vector.load %arg4[%c0_4, %c0_5] : memref<32x32xf32, #tpu.memory_space<vmem>>, vector<32x32xf32>
    %cst = arith.constant dense<0.000000e+00> : vector<16x32xf32>
    %6 = tpu.matmul %4, %5, %cst {dimension_numbers = #tpu.dot_dimension_numbers<[1], [0], [0], [1], [0, 0, 1, 1], [], []>, precision = #tpu.contract_precision<fp32>} : vector<16x32xf32>, vector<32x32xf32>, vector<16x32xf32> -> vector<16x32xf32>
    %7 = arith.addf %3, %6 : vector<16x32xf32>
    %c0_6 = arith.constant 0 : index
    %c0_7 = arith.constant 0 : index
    %8 = vector.load %arg7[%c0_6, %c0_7] : memref<16x32xf32, #tpu.memory_space<vmem>>, vector<16x32xf32>
    tpu.vector_store %arg7[%c0_6, %c0_7], %7 {strides = array<i32>} : memref<16x32xf32, #tpu.memory_space<vmem>>, vector<16x32xf32>,
    %c0_i32_8 = arith.constant 0 : i32
    %9 = arith.cmpi eq, %arg2, %c0_i32_8 : i32
    %10 = arith.extui %9 : i1 to i32
    %c0_i32_9 = arith.constant 0 : i32
    %11 = arith.cmpi ne, %10, %c0_i32_9 : i32
    scf.if %11 {
      %c0_10 = arith.constant 0 : index
      %c0_11 = arith.constant 0 : index
      %12 = vector.load %arg7[%c0_10, %c0_11] : memref<16x32xf32, #tpu.memory_space<vmem>>, vector<16x32xf32>
      %c0_12 = arith.constant 0 : index
      %c0_13 = arith.constant 0 : index
      %13 = vector.load %arg5[%c0_12, %c0_13] : memref<1x32xf32, #tpu.memory_space<vmem>>, vector<1x32xf32>
      %14 = vector.broadcast %13 : vector<1x32xf32> to vector<16x32xf32>
      %15 = arith.addf %12, %14 : vector<16x32xf32>
      %c0_14 = arith.constant 0 : index
      %c0_15 = arith.constant 0 : index
      %16 = vector.load %arg6[%c0_14, %c0_15] : memref<16x32xf32, #tpu.memory_space<vmem>>, vector<16x32xf32>
      tpu.vector_store %arg6[%c0_14, %c0_15], %15 {strides = array<i32>} : memref<16x32xf32, #tpu.memory_space<vmem>>, vector<16x32xf32>,
    } else {
    }
    return
  }
  func.func @transform_0(%arg0: i32, %arg1: i32, %arg2: i32) -> (i32, i32) {
    %c0_i32 = arith.constant 0 : i32
    return %arg0, %arg2 : i32, i32
  }
  func.func @transform_1(%arg0: i32, %arg1: i32, %arg2: i32) -> (i32, i32) {
    %c0_i32 = arith.constant 0 : i32
    return %arg2, %arg1 : i32, i32
  }
  func.func @transform_2(%arg0: i32, %arg1: i32, %arg2: i32) -> (i32, i32) {
    %c0_i32 = arith.constant 0 : i32
    %c0_i32_0 = arith.constant 0 : i32
    return %c0_i32, %arg1 : i32, i32
  }
  func.func @transform_3(%arg0: i32, %arg1: i32, %arg2: i32) -> (i32, i32) {
    %c0_i32 = arith.constant 0 : i32
    return %arg0, %arg1 : i32, i32
  }
}

module attributes {stable_mosaic.version = 11 : i64} {
  func.func @kernel(%arg0: i32, %arg1: memref<1x8x8xf32, #tpu.memory_space<vmem>>, %arg2: memref<1x8x8xf32, #tpu.memory_space<vmem>>, %arg3: memref<1x8x8xf32, #tpu.memory_space<vmem>>, %arg4: memref<1x8x8xf32, #tpu.memory_space<vmem>>) attributes {dimension_semantics = [#tpu.dimension_semantics<parallel>], iteration_bounds = array<i64: 8>, scalar_prefetch = 0 : i64, scratch_operands = 0 : i64, tpu.core_type = #tpu.core_type<tc>, window_params = [{transform_indices = @transform_0, window_bounds = array<i64: 1, 8, 8>}, {transform_indices = @transform_1, window_bounds = array<i64: 1, 8, 8>}, {transform_indices = @transform_2, window_bounds = array<i64: 1, 8, 8>}, {transform_indices = @transform_3, window_bounds = array<i64: 1, 8, 8>}]} {
    %c0 = arith.constant 0 : index
    %c0_0 = arith.constant 0 : index
    %c0_1 = arith.constant 0 : index
    %0 = vector.load %arg1[%c0, %c0_0, %c0_1] : memref<1x8x8xf32, #tpu.memory_space<vmem>>, vector<1x8x8xf32>
    %1 = vector.shape_cast %0 : vector<1x8x8xf32> to vector<8x8xf32>
    %c0_2 = arith.constant 0 : index
    %c0_3 = arith.constant 0 : index
    %c0_4 = arith.constant 0 : index
    %2 = vector.load %arg2[%c0_2, %c0_3, %c0_4] : memref<1x8x8xf32, #tpu.memory_space<vmem>>, vector<1x8x8xf32>
    %3 = vector.shape_cast %2 : vector<1x8x8xf32> to vector<8x8xf32>
    %c0_5 = arith.constant 0 : index
    %c0_6 = arith.constant 0 : index
    %c0_7 = arith.constant 0 : index
    %4 = vector.load %arg3[%c0_5, %c0_6, %c0_7] : memref<1x8x8xf32, #tpu.memory_space<vmem>>, vector<1x8x8xf32>
    %5 = vector.shape_cast %4 : vector<1x8x8xf32> to vector<8x8xf32>
    %cst = arith.constant dense<0.000000e+00> : vector<8x8xf32>
    %6 = tpu.matmul %1, %3, %cst {dimension_numbers = #tpu.dot_dimension_numbers<[1], [1], [0], [0], [0, 0, 1, 0], [], []>, precision = #tpu.contract_precision<fp32>} : vector<8x8xf32>, vector<8x8xf32>, vector<8x8xf32> -> vector<8x8xf32>
    %cst_8 = arith.constant 0.353553385 : f32
    %7 = vector.broadcast %cst_8 : f32 to vector<8x8xf32>
    %8 = arith.mulf %6, %7 : vector<8x8xf32>
    %cst_9 = arith.constant dense<0xFF800000> : vector<8xf32>
    %9 = vector.multi_reduction <maximumf>, %8, %cst_9 [1] : vector<8x8xf32> to vector<8xf32>
    %10 = vector.shape_cast %9 : vector<8xf32> to vector<8x1xf32>
    %11 = vector.broadcast %10 : vector<8x1xf32> to vector<8x8xf32>
    %12 = arith.subf %8, %11 : vector<8x8xf32>
    %13 = math.exp %12 : vector<8x8xf32>
    %cst_10 = arith.constant dense<0.000000e+00> : vector<8xf32>
    %14 = vector.multi_reduction <add>, %13, %cst_10 [1] : vector<8x8xf32> to vector<8xf32>
    %15 = vector.shape_cast %14 : vector<8xf32> to vector<8x1xf32>
    %16 = vector.broadcast %15 : vector<8x1xf32> to vector<8x8xf32>
    %17 = arith.divf %13, %16 : vector<8x8xf32>
    %cst_11 = arith.constant dense<0.000000e+00> : vector<8x8xf32>
    %18 = tpu.matmul %17, %5, %cst_11 {dimension_numbers = #tpu.dot_dimension_numbers<[1], [0], [0], [1], [0, 0, 1, 1], [], []>, precision = #tpu.contract_precision<fp32>} : vector<8x8xf32>, vector<8x8xf32>, vector<8x8xf32> -> vector<8x8xf32>
    %c0_12 = arith.constant 0 : index
    %c0_13 = arith.constant 0 : index
    %c0_14 = arith.constant 0 : index
    %19 = vector.load %arg4[%c0_12, %c0_13, %c0_14] : memref<1x8x8xf32, #tpu.memory_space<vmem>>, vector<1x8x8xf32>
    %20 = vector.shape_cast %19 : vector<1x8x8xf32> to vector<8x8xf32>
    %21 = vector.shape_cast %18 : vector<8x8xf32> to vector<1x8x8xf32>
    tpu.vector_store %arg4[%c0_12, %c0_13, %c0_14], %21 {strides = array<i32>} : memref<1x8x8xf32, #tpu.memory_space<vmem>>, vector<1x8x8xf32>,
    return
  }
  func.func @transform_0(%arg0: i32) -> (i32, i32, i32) {
    %c0_i32 = arith.constant 0 : i32
    %c0_i32_0 = arith.constant 0 : i32
    %c0_i32_1 = arith.constant 0 : i32
    return %arg0, %c0_i32, %c0_i32_0 : i32, i32, i32
  }
  func.func @transform_1(%arg0: i32) -> (i32, i32, i32) {
    %c0_i32 = arith.constant 0 : i32
    %c0_i32_0 = arith.constant 0 : i32
    %c0_i32_1 = arith.constant 0 : i32
    return %arg0, %c0_i32, %c0_i32_0 : i32, i32, i32
  }
  func.func @transform_2(%arg0: i32) -> (i32, i32, i32) {
    %c0_i32 = arith.constant 0 : i32
    %c0_i32_0 = arith.constant 0 : i32
    %c0_i32_1 = arith.constant 0 : i32
    return %arg0, %c0_i32, %c0_i32_0 : i32, i32, i32
  }
  func.func @transform_3(%arg0: i32) -> (i32, i32, i32) {
    %c0_i32 = arith.constant 0 : i32
    %c0_i32_0 = arith.constant 0 : i32
    %c0_i32_1 = arith.constant 0 : i32
    return %arg0, %c0_i32, %c0_i32_0 : i32, i32, i32
  }
}

module attributes {stable_mosaic.version = 11 : i64} {
  func.func @kernel(%arg0: i32, %arg1: i32, %arg2: i32, %arg3: memref<16x32xf32, #tpu.memory_space<vmem>>, %arg4: memref<32x32xf32, #tpu.memory_space<vmem>>, %arg5: memref<1x32xf32, #tpu.memory_space<vmem>>, %arg6: memref<16x32xf32, #tpu.memory_space<vmem>>, %arg7: memref<16x32xf32, #tpu.memory_space<vmem>>, %arg8: memref<16x32xf32, #tpu.memory_space<vmem>>) attributes {dimension_semantics = [#tpu.dimension_semantics<parallel>, #tpu.dimension_semantics<parallel>, #tpu.dimension_semantics<arbitrary>], iteration_bounds = array<i64: 1, 1, 1>, scalar_prefetch = 0 : i64, scratch_operands = 1 : i64, tpu.core_type = #tpu.core_type<tc>, window_params = [{transform_indices = @transform_0, window_bounds = array<i64: 16, 32>}, {transform_indices = @transform_1, window_bounds = array<i64: 32, 32>}, {transform_indices = @transform_2, window_bounds = array<i64: 1, 32>}, {transform_indices = @transform_3, window_bounds = array<i64: 16, 32>}, {transform_indices = @transform_4, window_bounds = array<i64: 16, 32>}]} {
    %c0_i32 = arith.constant 0 : i32
    %0 = arith.cmpi eq, %arg2, %c0_i32 : i32
    %1 = arith.extui %0 : i1 to i32
    %c0_i32_0 = arith.constant 0 : i32
    %2 = arith.cmpi ne, %1, %c0_i32_0 : i32
    scf.if %2 {
      %cst_10 = arith.constant 0.000000e+00 : f32
      %12 = vector.broadcast %cst_10 : f32 to vector<16x32xf32>
      %c0_11 = arith.constant 0 : index
      %c0_12 = arith.constant 0 : index
      %13 = vector.load %arg8[%c0_11, %c0_12] : memref<16x32xf32, #tpu.memory_space<vmem>>, vector<16x32xf32>
      tpu.vector_store %arg8[%c0_11, %c0_12], %12 {strides = array<i32>} : memref<16x32xf32, #tpu.memory_space<vmem>>, vector<16x32xf32>,
    } else {
    }
    %c0 = arith.constant 0 : index
    %c0_1 = arith.constant 0 : index
    %3 = vector.load %arg8[%c0, %c0_1] : memref<16x32xf32, #tpu.memory_space<vmem>>, vector<16x32xf32>
    %c0_2 = arith.constant 0 : index
    %c0_3 = arith.constant 0 : index
    %4 = vector.load %arg3[%c0_2, %c0_3] : memref<16x32xf32, #tpu.memory_space<vmem>>, vector<16x32xf32>
    %c0_4 = arith.constant 0 : index
    %c0_5 = arith.constant 0 : index
    %5 = vector.load %arg4[%c0_4, %c0_5] : memref<32x32xf32, #tpu.memory_space<vmem>>, vector<32x32xf32>
    %cst = arith.constant dense<0.000000e+00> : vector<16x32xf32>
    %6 = tpu.matmul %4, %5, %cst {dimension_numbers = #tpu.dot_dimension_numbers<[1], [0], [0], [1], [0, 0, 1, 1], [], []>, precision = #tpu.contract_precision<fp32>} : vector<16x32xf32>, vector<32x32xf32>, vector<16x32xf32> -> vector<16x32xf32>
    %7 = arith.addf %3, %6 : vector<16x32xf32>
    %c0_6 = arith.constant 0 : index
    %c0_7 = arith.constant 0 : index
    %8 = vector.load %arg8[%c0_6, %c0_7] : memref<16x32xf32, #tpu.memory_space<vmem>>, vector<16x32xf32>
    tpu.vector_store %arg8[%c0_6, %c0_7], %7 {strides = array<i32>} : memref<16x32xf32, #tpu.memory_space<vmem>>, vector<16x32xf32>,
    %c0_i32_8 = arith.constant 0 : i32
    %9 = arith.cmpi eq, %arg2, %c0_i32_8 : i32
    %10 = arith.extui %9 : i1 to i32
    %c0_i32_9 = arith.constant 0 : i32
    %11 = arith.cmpi ne, %10, %c0_i32_9 : i32
    scf.if %11 {
      %c0_10 = arith.constant 0 : index
      %c0_11 = arith.constant 0 : index
      %12 = vector.load %arg8[%c0_10, %c0_11] : memref<16x32xf32, #tpu.memory_space<vmem>>, vector<16x32xf32>
      %c0_12 = arith.constant 0 : index
      %c0_13 = arith.constant 0 : index
      %13 = vector.load %arg5[%c0_12, %c0_13] : memref<1x32xf32, #tpu.memory_space<vmem>>, vector<1x32xf32>
      %14 = vector.broadcast %13 : vector<1x32xf32> to vector<16x32xf32>
      %15 = arith.addf %12, %14 : vector<16x32xf32>
      %c0_14 = arith.constant 0 : index
      %c0_15 = arith.constant 0 : index
      %16 = vector.load %arg6[%c0_14, %c0_15] : memref<16x32xf32, #tpu.memory_space<vmem>>, vector<16x32xf32>
      %17 = arith.addf %15, %16 : vector<16x32xf32>
      %c0_16 = arith.constant 0 : index
      %c0_17 = arith.constant 0 : index
      %18 = vector.load %arg7[%c0_16, %c0_17] : memref<16x32xf32, #tpu.memory_space<vmem>>, vector<16x32xf32>
      tpu.vector_store %arg7[%c0_16, %c0_17], %17 {strides = array<i32>} : memref<16x32xf32, #tpu.memory_space<vmem>>, vector<16x32xf32>,
    } else {
    }
    return
  }
  func.func @transform_0(%arg0: i32, %arg1: i32, %arg2: i32) -> (i32, i32) {
    %c0_i32 = arith.constant 0 : i32
    return %arg0, %arg2 : i32, i32
  }
  func.func @transform_1(%arg0: i32, %arg1: i32, %arg2: i32) -> (i32, i32) {
    %c0_i32 = arith.constant 0 : i32
    return %arg2, %arg1 : i32, i32
  }
  func.func @transform_2(%arg0: i32, %arg1: i32, %arg2: i32) -> (i32, i32) {
    %c0_i32 = arith.constant 0 : i32
    %c0_i32_0 = arith.constant 0 : i32
    return %c0_i32, %arg1 : i32, i32
  }
  func.func @transform_3(%arg0: i32, %arg1: i32, %arg2: i32) -> (i32, i32) {
    %c0_i32 = arith.constant 0 : i32
    return %arg0, %arg1 : i32, i32
  }
  func.func @transform_4(%arg0: i32, %arg1: i32, %arg2: i32) -> (i32, i32) {
    %c0_i32 = arith.constant 0 : i32
    return %arg0, %arg1 : i32, i32
  }
}

module attributes {stable_mosaic.version = 11 : i64} {
  func.func @kernel(%arg0: i32, %arg1: i32, %arg2: i32, %arg3: memref<16x32xf32, #tpu.memory_space<vmem>>, %arg4: memref<32x64xf32, #tpu.memory_space<vmem>>, %arg5: memref<1x64xf32, #tpu.memory_space<vmem>>, %arg6: memref<16x64xf32, #tpu.memory_space<vmem>>, %arg7: memref<16x64xf32, #tpu.memory_space<vmem>>) attributes {dimension_semantics = [#tpu.dimension_semantics<parallel>, #tpu.dimension_semantics<parallel>, #tpu.dimension_semantics<arbitrary>], iteration_bounds = array<i64: 1, 1, 1>, scalar_prefetch = 0 : i64, scratch_operands = 1 : i64, tpu.core_type = #tpu.core_type<tc>, window_params = [{transform_indices = @transform_0, window_bounds = array<i64: 16, 32>}, {transform_indices = @transform_1, window_bounds = array<i64: 32, 64>}, {transform_indices = @transform_2, window_bounds = array<i64: 1, 64>}, {transform_indices = @transform_3, window_bounds = array<i64: 16, 64>}]} {
    %c0_i32 = arith.constant 0 : i32
    %0 = arith.cmpi eq, %arg2, %c0_i32 : i32
    %1 = arith.extui %0 : i1 to i32
    %c0_i32_0 = arith.constant 0 : i32
    %2 = arith.cmpi ne, %1, %c0_i32_0 : i32
    scf.if %2 {
      %cst_10 = arith.constant 0.000000e+00 : f32
      %12 = vector.broadcast %cst_10 : f32 to vector<16x64xf32>
      %c0_11 = arith.constant 0 : index
      %c0_12 = arith.constant 0 : index
      %13 = vector.load %arg7[%c0_11, %c0_12] : memref<16x64xf32, #tpu.memory_space<vmem>>, vector<16x64xf32>
      tpu.vector_store %arg7[%c0_11, %c0_12], %12 {strides = array<i32>} : memref<16x64xf32, #tpu.memory_space<vmem>>, vector<16x64xf32>,
    } else {
    }
    %c0 = arith.constant 0 : index
    %c0_1 = arith.constant 0 : index
    %3 = vector.load %arg7[%c0, %c0_1] : memref<16x64xf32, #tpu.memory_space<vmem>>, vector<16x64xf32>
    %c0_2 = arith.constant 0 : index
    %c0_3 = arith.constant 0 : index
    %4 = vector.load %arg3[%c0_2, %c0_3] : memref<16x32xf32, #tpu.memory_space<vmem>>, vector<16x32xf32>
    %c0_4 = arith.constant 0 : index
    %c0_5 = arith.constant 0 : index
    %5 = vector.load %arg4[%c0_4, %c0_5] : memref<32x64xf32, #tpu.memory_space<vmem>>, vector<32x64xf32>
    %cst = arith.constant dense<0.000000e+00> : vector<16x64xf32>
    %6 = tpu.matmul %4, %5, %cst {dimension_numbers = #tpu.dot_dimension_numbers<[1], [0], [0], [1], [0, 0, 1, 1], [], []>, precision = #tpu.contract_precision<fp32>} : vector<16x32xf32>, vector<32x64xf32>, vector<16x64xf32> -> vector<16x64xf32>
    %7 = arith.addf %3, %6 : vector<16x64xf32>
    %c0_6 = arith.constant 0 : index
    %c0_7 = arith.constant 0 : index
    %8 = vector.load %arg7[%c0_6, %c0_7] : memref<16x64xf32, #tpu.memory_space<vmem>>, vector<16x64xf32>
    tpu.vector_store %arg7[%c0_6, %c0_7], %7 {strides = array<i32>} : memref<16x64xf32, #tpu.memory_space<vmem>>, vector<16x64xf32>,
    %c0_i32_8 = arith.constant 0 : i32
    %9 = arith.cmpi eq, %arg2, %c0_i32_8 : i32
    %10 = arith.extui %9 : i1 to i32
    %c0_i32_9 = arith.constant 0 : i32
    %11 = arith.cmpi ne, %10, %c0_i32_9 : i32
    scf.if %11 {
      %c0_10 = arith.constant 0 : index
      %c0_11 = arith.constant 0 : index
      %12 = vector.load %arg7[%c0_10, %c0_11] : memref<16x64xf32, #tpu.memory_space<vmem>>, vector<16x64xf32>
      %c0_12 = arith.constant 0 : index
      %c0_13 = arith.constant 0 : index
      %13 = vector.load %arg5[%c0_12, %c0_13] : memref<1x64xf32, #tpu.memory_space<vmem>>, vector<1x64xf32>
      %14 = vector.broadcast %13 : vector<1x64xf32> to vector<16x64xf32>
      %15 = arith.addf %12, %14 : vector<16x64xf32>
      %cst_14 = arith.constant 0.000000e+00 : f32
      %16 = vector.broadcast %cst_14 : f32 to vector<16x64xf32>
      %17 = arith.maximumf %15, %16 : vector<16x64xf32>
      %c0_15 = arith.constant 0 : index
      %c0_16 = arith.constant 0 : index
      %18 = vector.load %arg6[%c0_15, %c0_16] : memref<16x64xf32, #tpu.memory_space<vmem>>, vector<16x64xf32>
      tpu.vector_store %arg6[%c0_15, %c0_16], %17 {strides = array<i32>} : memref<16x64xf32, #tpu.memory_space<vmem>>, vector<16x64xf32>,
    } else {
    }
    return
  }
  func.func @transform_0(%arg0: i32, %arg1: i32, %arg2: i32) -> (i32, i32) {
    %c0_i32 = arith.constant 0 : i32
    return %arg0, %arg2 : i32, i32
  }
  func.func @transform_1(%arg0: i32, %arg1: i32, %arg2: i32) -> (i32, i32) {
    %c0_i32 = arith.constant 0 : i32
    return %arg2, %arg1 : i32, i32
  }
  func.func @transform_2(%arg0: i32, %arg1: i32, %arg2: i32) -> (i32, i32) {
    %c0_i32 = arith.constant 0 : i32
    %c0_i32_0 = arith.constant 0 : i32
    return %c0_i32, %arg1 : i32, i32
  }
  func.func @transform_3(%arg0: i32, %arg1: i32, %arg2: i32) -> (i32, i32) {
    %c0_i32 = arith.constant 0 : i32
    return %arg0, %arg1 : i32, i32
  }
}

module attributes {stable_mosaic.version = 11 : i64} {
  func.func @kernel(%arg0: i32, %arg1: i32, %arg2: i32, %arg3: memref<16x64xf32, #tpu.memory_space<vmem>>, %arg4: memref<64x32xf32, #tpu.memory_space<vmem>>, %arg5: memref<1x32xf32, #tpu.memory_space<vmem>>, %arg6: memref<16x32xf32, #tpu.memory_space<vmem>>, %arg7: memref<16x32xf32, #tpu.memory_space<vmem>>, %arg8: memref<16x32xf32, #tpu.memory_space<vmem>>) attributes {dimension_semantics = [#tpu.dimension_semantics<parallel>, #tpu.dimension_semantics<parallel>, #tpu.dimension_semantics<arbitrary>], iteration_bounds = array<i64: 1, 1, 1>, scalar_prefetch = 0 : i64, scratch_operands = 1 : i64, tpu.core_type = #tpu.core_type<tc>, window_params = [{transform_indices = @transform_0, window_bounds = array<i64: 16, 64>}, {transform_indices = @transform_1, window_bounds = array<i64: 64, 32>}, {transform_indices = @transform_2, window_bounds = array<i64: 1, 32>}, {transform_indices = @transform_3, window_bounds = array<i64: 16, 32>}, {transform_indices = @transform_4, window_bounds = array<i64: 16, 32>}]} {
    %c0_i32 = arith.constant 0 : i32
    %0 = arith.cmpi eq, %arg2, %c0_i32 : i32
    %1 = arith.extui %0 : i1 to i32
    %c0_i32_0 = arith.constant 0 : i32
    %2 = arith.cmpi ne, %1, %c0_i32_0 : i32
    scf.if %2 {
      %cst_10 = arith.constant 0.000000e+00 : f32
      %12 = vector.broadcast %cst_10 : f32 to vector<16x32xf32>
      %c0_11 = arith.constant 0 : index
      %c0_12 = arith.constant 0 : index
      %13 = vector.load %arg8[%c0_11, %c0_12] : memref<16x32xf32, #tpu.memory_space<vmem>>, vector<16x32xf32>
      tpu.vector_store %arg8[%c0_11, %c0_12], %12 {strides = array<i32>} : memref<16x32xf32, #tpu.memory_space<vmem>>, vector<16x32xf32>,
    } else {
    }
    %c0 = arith.constant 0 : index
    %c0_1 = arith.constant 0 : index
    %3 = vector.load %arg8[%c0, %c0_1] : memref<16x32xf32, #tpu.memory_space<vmem>>, vector<16x32xf32>
    %c0_2 = arith.constant 0 : index
    %c0_3 = arith.constant 0 : index
    %4 = vector.load %arg3[%c0_2, %c0_3] : memref<16x64xf32, #tpu.memory_space<vmem>>, vector<16x64xf32>
    %c0_4 = arith.constant 0 : index
    %c0_5 = arith.constant 0 : index
    %5 = vector.load %arg4[%c0_4, %c0_5] : memref<64x32xf32, #tpu.memory_space<vmem>>, vector<64x32xf32>
    %cst = arith.constant dense<0.000000e+00> : vector<16x32xf32>
    %6 = tpu.matmul %4, %5, %cst {dimension_numbers = #tpu.dot_dimension_numbers<[1], [0], [0], [1], [0, 0, 1, 1], [], []>, precision = #tpu.contract_precision<fp32>} : vector<16x64xf32>, vector<64x32xf32>, vector<16x32xf32> -> vector<16x32xf32>
    %7 = arith.addf %3, %6 : vector<16x32xf32>
    %c0_6 = arith.constant 0 : index
    %c0_7 = arith.constant 0 : index
    %8 = vector.load %arg8[%c0_6, %c0_7] : memref<16x32xf32, #tpu.memory_space<vmem>>, vector<16x32xf32>
    tpu.vector_store %arg8[%c0_6, %c0_7], %7 {strides = array<i32>} : memref<16x32xf32, #tpu.memory_space<vmem>>, vector<16x32xf32>,
    %c0_i32_8 = arith.constant 0 : i32
    %9 = arith.cmpi eq, %arg2, %c0_i32_8 : i32
    %10 = arith.extui %9 : i1 to i32
    %c0_i32_9 = arith.constant 0 : i32
    %11 = arith.cmpi ne, %10, %c0_i32_9 : i32
    scf.if %11 {
      %c0_10 = arith.constant 0 : index
      %c0_11 = arith.constant 0 : index
      %12 = vector.load %arg8[%c0_10, %c0_11] : memref<16x32xf32, #tpu.memory_space<vmem>>, vector<16x32xf32>
      %c0_12 = arith.constant 0 : index
      %c0_13 = arith.constant 0 : index
      %13 = vector.load %arg5[%c0_12, %c0_13] : memref<1x32xf32, #tpu.memory_space<vmem>>, vector<1x32xf32>
      %14 = vector.broadcast %13 : vector<1x32xf32> to vector<16x32xf32>
      %15 = arith.addf %12, %14 : vector<16x32xf32>
      %c0_14 = arith.constant 0 : index
      %c0_15 = arith.constant 0 : index
      %16 = vector.load %arg6[%c0_14, %c0_15] : memref<16x32xf32, #tpu.memory_space<vmem>>, vector<16x32xf32>
      %17 = arith.addf %15, %16 : vector<16x32xf32>
      %c0_16 = arith.constant 0 : index
      %c0_17 = arith.constant 0 : index
      %18 = vector.load %arg7[%c0_16, %c0_17] : memref<16x32xf32, #tpu.memory_space<vmem>>, vector<16x32xf32>
      tpu.vector_store %arg7[%c0_16, %c0_17], %17 {strides = array<i32>} : memref<16x32xf32, #tpu.memory_space<vmem>>, vector<16x32xf32>,
    } else {
    }
    return
  }
  func.func @transform_0(%arg0: i32, %arg1: i32, %arg2: i32) -> (i32, i32) {
    %c0_i32 = arith.constant 0 : i32
    return %arg0, %arg2 : i32, i32
  }
  func.func @transform_1(%arg0: i32, %arg1: i32, %arg2: i32) -> (i32, i32) {
    %c0_i32 = arith.constant 0 : i32
    return %arg2, %arg1 : i32, i32
  }
  func.func @transform_2(%arg0: i32, %arg1: i32, %arg2: i32) -> (i32, i32) {
    %c0_i32 = arith.constant 0 : i32
    %c0_i32_0 = arith.constant 0 : i32
    return %c0_i32, %arg1 : i32, i32
  }
  func.func @transform_3(%arg0: i32, %arg1: i32, %arg2: i32) -> (i32, i32) {
    %c0_i32 = arith.constant 0 : i32
    return %arg0, %arg1 : i32, i32
  }
  func.func @transform_4(%arg0: i32, %arg1: i32, %arg2: i32) -> (i32, i32) {
    %c0_i32 = arith.constant 0 : i32
    return %arg0, %arg1 : i32, i32
  }
}

module attributes {stable_mosaic.version = 11 : i64} {
  func.func @kernel(%arg0: i32, %arg1: memref<16x32xf32, #tpu.memory_space<vmem>>, %arg2: memref<1x32xf32, #tpu.memory_space<vmem>>, %arg3: memref<1x32xf32, #tpu.memory_space<vmem>>, %arg4: memref<16x32xf32, #tpu.memory_space<vmem>>) attributes {dimension_semantics = [#tpu.dimension_semantics<parallel>], iteration_bounds = array<i64: 1>, scalar_prefetch = 0 : i64, scratch_operands = 0 : i64, tpu.core_type = #tpu.core_type<tc>, window_params = [{transform_indices = @transform_0, window_bounds = array<i64: 16, 32>}, {pipeline_mode = #tpu.pipeline_mode<synchronous>, transform_indices = @transform_1, window_bounds = array<i64: 1, 32>}, {pipeline_mode = #tpu.pipeline_mode<synchronous>, transform_indices = @transform_2, window_bounds = array<i64: 1, 32>}, {transform_indices = @transform_3, window_bounds = array<i64: 16, 32>}]} {
    %c0 = arith.constant 0 : index
    %c0_0 = arith.constant 0 : index
    %0 = vector.load %arg1[%c0, %c0_0] : memref<16x32xf32, #tpu.memory_space<vmem>>, vector<16x32xf32>
    %cst = arith.constant dense<0.000000e+00> : vector<16xf32>
    %1 = vector.multi_reduction <add>, %0, %cst [1] : vector<16x32xf32> to vector<16xf32>
    %2 = vector.shape_cast %1 : vector<16xf32> to vector<16x1xf32>
    %cst_1 = arith.constant 3.200000e+01 : f32
    %3 = vector.broadcast %cst_1 : f32 to vector<16x1xf32>
    %4 = arith.divf %2, %3 : vector<16x1xf32>
    %5 = vector.broadcast %4 : vector<16x1xf32> to vector<16x32xf32>
    %6 = arith.subf %0, %5 : vector<16x32xf32>
    %7 = arith.mulf %6, %6 : vector<16x32xf32>
    %cst_2 = arith.constant dense<0.000000e+00> : vector<16xf32>
    %8 = vector.multi_reduction <add>, %7, %cst_2 [1] : vector<16x32xf32> to vector<16xf32>
    %9 = vector.shape_cast %8 : vector<16xf32> to vector<16x1xf32>
    %cst_3 = arith.constant 0.0322580636 : f32
    %10 = vector.broadcast %cst_3 : f32 to vector<16x1xf32>
    %11 = arith.mulf %9, %10 : vector<16x1xf32>
    %c0_4 = arith.constant 0 : index
    %c0_5 = arith.constant 0 : index
    %12 = vector.load %arg2[%c0_4, %c0_5] : memref<1x32xf32, #tpu.memory_space<vmem>>, vector<1x32xf32>
    %13 = vector.broadcast %12 : vector<1x32xf32> to vector<16x32xf32>
    %14 = arith.mulf %13, %6 : vector<16x32xf32>
    %15 = math.sqrt %11 : vector<16x1xf32>
    %cst_6 = arith.constant 9.99999997E-7 : f32
    %16 = vector.broadcast %cst_6 : f32 to vector<16x1xf32>
    %17 = arith.addf %15, %16 : vector<16x1xf32>
    %18 = vector.broadcast %17 : vector<16x1xf32> to vector<16x32xf32>
    %19 = arith.divf %14, %18 : vector<16x32xf32>
    %c0_7 = arith.constant 0 : index
    %c0_8 = arith.constant 0 : index
    %20 = vector.load %arg3[%c0_7, %c0_8] : memref<1x32xf32, #tpu.memory_space<vmem>>, vector<1x32xf32>
    %21 = vector.broadcast %20 : vector<1x32xf32> to vector<16x32xf32>
    %22 = arith.addf %19, %21 : vector<16x32xf32>
    %c0_9 = arith.constant 0 : index
    %c0_10 = arith.constant 0 : index
    %23 = vector.load %arg4[%c0_9, %c0_10] : memref<16x32xf32, #tpu.memory_space<vmem>>, vector<16x32xf32>
    tpu.vector_store %arg4[%c0_9, %c0_10], %22 {strides = array<i32>} : memref<16x32xf32, #tpu.memory_space<vmem>>, vector<16x32xf32>,
    return
  }
  func.func @transform_0(%arg0: i32) -> (i32, i32) {
    %c0_i32 = arith.constant 0 : i32
    %c0_i32_0 = arith.constant 0 : i32
    return %arg0, %c0_i32 : i32, i32
  }
  func.func @transform_1(%arg0: i32) -> (i32, i32) {
    %c0_i32 = arith.constant 0 : i32
    %c0_i32_0 = arith.constant 0 : i32
    %c0_i32_1 = arith.constant 0 : i32
    return %c0_i32, %c0_i32_0 : i32, i32
  }
  func.func @transform_2(%arg0: i32) -> (i32, i32) {
    %c0_i32 = arith.constant 0 : i32
    %c0_i32_0 = arith.constant 0 : i32
    %c0_i32_1 = arith.constant 0 : i32
    return %c0_i32, %c0_i32_0 : i32, i32
  }
  func.func @transform_3(%arg0: i32) -> (i32, i32) {
    %c0_i32 = arith.constant 0 : i32
    %c0_i32_0 = arith.constant 0 : i32
    return %arg0, %c0_i32 : i32, i32
  }
}

</mosaic_0001>

<bundles_post_ra>
// kernel: encoder_forward.19
= control target key start
LH: loop header
LB: loop body
LE: loop exit
PB: predicated region body
PF: predicated region fallthrough
CT: control target
= control target key end

     0   :  { %vm16_vm0 = vcmask 261120   ;;  %s136_s0 = inlined_call_operand.vmem [shape: f32[16,32], index: 0, kind: input, shape index: {}]   ;;  %s137_s1 = inlined_call_operand.vmem [shape: f32[1,32], index: 1, kind: input, shape index: {}]   ;;  %s138_s2 = inlined_call_operand.vmem [shape: f32[1,32], index: 2, kind: input, shape index: {}]   ;;  %s139_s3 = inlined_call_operand.vmem [shape: f32[16,32], index: 3, kind: output, shape index: {}]  }
   0x1   :  { %v14_v0 = vld [vmem:[%s136_s0] sm:$0xff]  ;;  %v15_v1 = vld [vmem:[%s136_s0 + $0x8] sm:$0xff] }
   0x2   :  { %v17_v2 = vsel %vm16_vm0, %v14_v0, 0.0  ;;  %v20_v3 = vsel %vm16_vm0, %v15_v1, 0.0  ;;  %v82_v30 = vld [vmem:[%s137_s1] ss:$0 sm:$0xff] }
   0x3   :  { %18 = vadd.xlane.f32.xlu0 %v17_v2  ;;  %v83_v33 = vld [vmem:[%s138_s2] ss:$0 sm:$0xff] }
   0x7   :  { %21 = vadd.xlane.f32.xlu0 %v20_v3 }
  0x8c   :  { %v19_v4 = vpop.xlane.xlu0 %18 }
  0x8d   :  { %v24_v5 = vmul.f32 0.03125, %v19_v4 }
  0x8f   :  { %v26_v6 = vsub.f32 %v14_v0, %v24_v5 }
  0x90   :  { %v22_v7 = vpop.xlane.xlu0 %21 }
  0x91   :  { %v25_v8 = vmul.f32 0.03125, %v22_v7  ;;  %v28_v9 = vmul.f32 %v26_v6, %v26_v6  ;;  %v45_v31 = vmul.f32 %v82_v30, %v26_v6 }
  0x93   :  { %v27_v10 = vsub.f32 %v15_v1, %v25_v8  ;;  %v30_v11 = vsel %vm16_vm0, %v28_v9, 0.0 }
  0x94   :  { %31 = vadd.xlane.f32.xlu1 %v30_v11 }
  0x95   :  { %v29_v12 = vmul.f32 %v27_v10, %v27_v10  ;;  %v46_v35 = vmul.f32 %v82_v30, %v27_v10 }
  0x97   :  { %v33_v13 = vsel %vm16_vm0, %v29_v12, 0.0 }
  0x98   :  { %34 = vadd.xlane.f32.xlu1 %v33_v13 }
 0x11d   :  { %v32_v14 = vpop.xlane.xlu1 %31 }
 0x11e   :  { %v36_v15 = vmul.f32 0.032258064, %v32_v14 }
 0x120   :  { %84 = vrsqrt.f32 %v36_v15  ;;  %vm49_vm1 = vcmp.eq.f32.partialorder %v36_v15, inf  ;;  %v52_v20 = vand.u32 2147483648, %v36_v15  ;;  %vm51_vm2 = vcmp.eq.f32.partialorder %v36_v15, 0.0 }
 0x121   :  { %v35_v16 = vpop.xlane.xlu1 %34 }
 0x122   :  { %v37_v17 = vmul.f32 0.032258064, %v35_v16 }
 0x124   :  { %86 = vrsqrt.f32 %v37_v17  ;;  %vm56_vm3 = vcmp.eq.f32.partialorder %v37_v17, inf  ;;  %v59_v26 = vand.u32 2147483648, %v37_v17  ;;  %vm58_vm4 = vcmp.eq.f32.partialorder %v37_v17, 0.0 }
 0x12d   :  { %v85_v18 = vpop.eup %84 }
 0x12e   :  { %v48_v19 = vmul.f32 %v85_v18, %v36_v15 }
 0x130   :  { %v50_v21 = vsel %vm49_vm1, %v36_v15, %v48_v19 }
 0x131   :  { %v87_v22 = vpop.eup %86  ;;  %v53_v23 = vsel %vm51_vm2, %v52_v20, %v50_v21 }
 0x132   :  { %v61_v24 = vadd.f32 1e-06, %v53_v23  ;;  %v55_v25 = vmul.f32 %v87_v22, %v37_v17 }
 0x134   :  { %88 = vrcp.f32 %v61_v24  ;;  %v57_v27 = vsel %vm56_vm3, %v37_v17, %v55_v25 }
 0x135   :  { %v60_v28 = vsel %vm58_vm4, %v59_v26, %v57_v27 }
 0x136   :  { %v62_v29 = vadd.f32 1e-06, %v60_v28 }
 0x138   :  { %90 = vrcp.f32 %v62_v29 }
 0x141   :  { %v89_v32 = vpop.eup %88 }
 0x142   :  { %v64_v34 = vmul.f32 %v89_v32, %v45_v31 }
 0x144   :  { %v74_v36 = vadd.f32 %v83_v33, %v64_v34 }
 0x145   :  { %v91_v37 = vpop.eup %90 }
 0x146   :  { %76 = vst.msk [vmem:[%s139_s3] sm:$0xff] %vm16_vm0, %v74_v36  ;;  %v66_v38 = vmul.f32 %v91_v37, %v46_v35 }
 0x148   :  { %v75_v39 = vadd.f32 %v83_v33, %v66_v38 }
 0x14a   :  { %77 = vst.msk [vmem:[%s139_s3 + $0x8] sm:$0xff] %vm16_vm0, %v75_v39 }

// kernel: encoder_forward.22
= control target key start
LH: loop header
LB: loop body
LE: loop exit
PB: predicated region body
PF: predicated region fallthrough
CT: control target
= control target key end

     0   :  { %vm18_vm0 = vcmask 261120   ;;  %v692_v38 = vmov 0.0   ;;  %s796_s1 = inlined_call_operand.vmem [shape: f32[32,32], index: 1, kind: input, shape index: {}]   ;;  %s797_s0 = inlined_call_operand.vmem [shape: f32[16,32], index: 0, kind: input, shape index: {}]   ;;  %s798_s2 = inlined_call_operand.vmem [shape: f32[1,32], index: 2, kind: input, shape index: {}]   ;;  %s799_s3 = inlined_call_operand.vmem [shape: f32[16,32], index: 3, kind: output, shape index: {}]  }
   0x1   :  { %v28_v0 = vld [vmem:[%s796_s1 + $0x18] sm:$0xff]  ;;  %v27_v1 = vld [vmem:[%s796_s1 + $0x10] sm:$0xff]  ;;  %v26_v2 = vld [vmem:[%s796_s1 + $0x8] sm:$0xff]  ;;  %20 = vst.msk [vmem:[#allocation2 + $0x8] sm:$0xff] %vm18_vm0, %v692_v38 }
   0x2   :  { %v722_v3 = vand.u32 4294901760, %v28_v0  ;;  %v724_v4 = vand.u32 4294901760, %v27_v1  ;;  %v726_v5 = vand.u32 4294901760, %v26_v2  ;;  %v25_v6 = vld [vmem:[%s796_s1] sm:$0xff]  ;;  %v24_v8 = vld [vmem:[%s797_s0 + $0x8] sm:$0xff]  ;;  %19 = vst.msk [vmem:[#allocation2] sm:$0xff] %vm18_vm0, %v692_v38 }
   0x3   :  { %v23_v7 = vld [vmem:[%s797_s0] sm:$0xff]  ;;  %v737_v9 = vand.u32 4294901760, %v25_v6  ;;  %v34_v11 = vsel %vm18_vm0, %v24_v8, 0 }
   0x4   :  { %v31_v10 = vsel %vm18_vm0, %v23_v7, 0  ;;  %625 = vmatprep.subr.mxu0 %v722_v3  ;;  %v151_v12 = vsub.f32 %v28_v0, %v722_v3  ;;  %v158_v14 = vsub.f32 %v27_v1, %v724_v4  ;;  %v746_v15 = vand.u32 4294901760, %v34_v11  ;;  %v588_v1 = vld [vmem:[%s798_s2] ss:$0 sm:$0xff] }
   0x5   :  { %v743_v13 = vand.u32 4294901760, %v31_v10  ;;  %626 = vmatpush3.msra.mxu0 %v722_v3  ;;  %v165_v16 = vsub.f32 %v26_v2, %v726_v5  ;;  %v172_v17 = vsub.f32 %v25_v6, %v737_v9 }
   0x6   :  { %627 = vmatprep.subr.mxu0 %v724_v4  ;;  %v152_v18 = vand.u32 4294901760, %v151_v12  ;;  %v159_v20 = vand.u32 4294901760, %v158_v14  ;;  %v116_v21 = vsub.f32 %v34_v11, %v746_v15 }
   0x7   :  { %v106_v19 = vsub.f32 %v31_v10, %v743_v13  ;;  %644 = vmatprep.mubr.f32.mxu1 %v743_v13  ;;  %628 = vmatpush3.msra.mxu0 %v724_v4  ;;  %v166_v22 = vand.u32 4294901760, %v165_v16  ;;  %v173_v23 = vand.u32 4294901760, %v172_v17 }
   0x8   :  { %629 = vmatprep.subr.mxu0 %v726_v5  ;;  %v153_v24 = vsub.f32 %v151_v12, %v152_v18  ;;  %v160_v26 = vsub.f32 %v158_v14, %v159_v20  ;;  %v117_v27 = vand.u32 4294901760, %v116_v21  ;;  %v22_v56 = vld [vmem:[#allocation2 + $0x8] sm:$0xff] }
   0x9   :  { %v107_v25 = vand.u32 4294901760, %v106_v19  ;;  %630 = vmatpush3.msra.mxu0 %v726_v5  ;;  %v167_v28 = vsub.f32 %v165_v16, %v166_v22  ;;  %v174_v29 = vsub.f32 %v172_v17, %v173_v23  ;;  %v21_v60 = vld [vmem:[#allocation2] sm:$0xff] }
   0xa   :  { %631 = vmatprep.subr.mxu0 %v737_v9  ;;  %v154_v30 = vand.u32 4294901760, %v153_v24  ;;  %v161_v32 = vand.u32 4294901760, %v160_v26  ;;  %v118_v33 = vsub.f32 %v116_v21, %v117_v27 }
   0xb   :  { %v108_v31 = vsub.f32 %v106_v19, %v107_v25  ;;  %632 = vmatpush3.msra.mxu0 %v737_v9  ;;  %v168_v36 = vand.u32 4294901760, %v167_v28  ;;  %v175_v37 = vand.u32 4294901760, %v174_v29 }
   0xc   :  { %636 = vmatprep.subr.mxu1 %v154_v30  ;;  %647 = vmatprep.subr.mxu0 %v151_v12  ;;  %v119_v35 = vand.u32 4294901760, %v118_v33 }
   0xd   :  { %v109_v34 = vand.u32 4294901760, %v108_v31  ;;  %637 = vmatpush3.msra.mxu1 %v154_v30 }
   0xe   :  { %638 = vmatprep.subr.mxu1 %v161_v32 }
   0xf   :  { %633 = vmatprep.mubr.f32.mxu0 %v109_v34  ;;  %639 = vmatpush3.msra.mxu1 %v161_v32 }
  0x10   :  { %634 = vmatmul.mubr.f32.vlgmr.msra.gmra.mxu0 %v119_v35  ;;  %640 = vmatprep.subr.mxu1 %v168_v36 }
  0x11   :  { %648 = vmatpush3.msra.mxu0 %v151_v12  ;;  %641 = vmatpush3.msra.mxu1 %v168_v36 }
  0x12   :  { %649 = vmatprep.subr.mxu0 %v158_v14  ;;  %642 = vmatprep.subr.mxu1 %v175_v37 }
  0x13   :  { %650 = vmatpush3.msra.mxu0 %v158_v14  ;;  %643 = vmatpush3.msra.mxu1 %v175_v37 }
  0x14   :  { %651 = vmatprep.subr.mxu0 %v165_v16  ;;  %645 = vmatmul.mubr.f32.vlgmr.msra.gmra.mxu1 %v746_v15 }
  0x15   :  { %652 = vmatpush3.msra.mxu0 %v165_v16  ;;  %658 = vmatprep.subr.mxu1 %v722_v3 }
  0x16   :  { %653 = vmatprep.subr.mxu0 %v172_v17  ;;  %655 = vmatprep.mubr.f32.mxu0 %v106_v19 }
  0x17   :  { %654 = vmatpush3.msra.mxu0 %v172_v17  ;;  %659 = vmatpush3.msra.mxu1 %v722_v3 }
  0x18   :  { %656 = vmatmul.mubr.f32.vlgmr.msra.gmra.mxu0 %v116_v21  ;;  %660 = vmatprep.subr.mxu1 %v724_v4 }
  0x19   :  { %669 = vmatprep.subr.mxu0 %v152_v18  ;;  %661 = vmatpush3.msra.mxu1 %v724_v4 }
  0x1a   :  { %670 = vmatpush3.msra.mxu0 %v152_v18  ;;  %662 = vmatprep.subr.mxu1 %v726_v5 }
  0x1b   :  { %671 = vmatprep.subr.mxu0 %v159_v20  ;;  %663 = vmatpush3.msra.mxu1 %v726_v5 }
  0x1c   :  { %672 = vmatpush3.msra.mxu0 %v159_v20  ;;  %664 = vmatprep.subr.mxu1 %v737_v9 }
  0x1d   :  { %673 = vmatprep.subr.mxu0 %v166_v22  ;;  %665 = vmatpush3.msra.mxu1 %v737_v9 }
  0x1e   :  { %666 = vmatprep.mubr.f32.mxu1 %v107_v25  ;;  %674 = vmatpush3.msra.mxu0 %v166_v22 }
  0x1f   :  { %667 = vmatmul.mubr.f32.vlgmr.msra.gmra.mxu1 %v117_v27  ;;  %675 = vmatprep.subr.mxu0 %v173_v23 }
  0x20   :  { %680 = vmatprep.subr.mxu1 %v722_v3  ;;  %676 = vmatpush3.msra.mxu0 %v173_v23 }
  0x21   :  { %677 = vmatprep.mubr.f32.mxu0 %v743_v13  ;;  %681 = vmatpush3.msra.mxu1 %v722_v3 }
  0x22   :  { %678 = vmatmul.mubr.f32.vlgmr.msra.gmra.mxu0 %v746_v15  ;;  %682 = vmatprep.subr.mxu1 %v724_v4 }
  0x23   :  { %688 = vmatprep.mubr.f32.mxu1 %v743_v13  ;;  %683 = vmatpush3.msra.mxu1 %v724_v4 }
  0x24   :  { %684 = vmatprep.subr.mxu1 %v726_v5 }
  0x25   :  { %685 = vmatpush3.msra.mxu1 %v726_v5 }
  0x26   :  { %686 = vmatprep.subr.mxu1 %v737_v9 }
  0x27   :  { %687 = vmatpush3.msra.mxu1 %v737_v9 }
  0x28   :  { %689 = vmatmul.mubr.f32.vlgmr.msra.gmra.mxu1 %v746_v15 }
  0xd0   :  { %v635_v39 = vpop.f32.mrf.mxu0 }
  0xd2   :  { %v111_v40 = vpop.f32.mrf.mxu0 }
  0xd4   :  { %v646_v41 = vpop.f32.mrf.mxu1 }
  0xd5   :  { %v219_v44 = vadd.f32 %v646_v41, %v635_v39 }
  0xd6   :  { %v212_v42 = vpop.f32.mrf.mxu1 }
  0xd7   :  { %v213_v46 = vadd.f32 %v212_v42, %v111_v40 }
  0xd8   :  { %v657_v43 = vpop.f32.mrf.mxu0 }
  0xd9   :  { %v306_v48 = vadd.f32 %v657_v43, %v219_v44 }
  0xda   :  { %v298_v47 = vpop.f32.mrf.mxu0 }
  0xdb   :  { %v299_v51 = vadd.f32 %v298_v47, %v213_v46 }
  0xdf   :  { %v668_v45 = vpop.f32.mrf.mxu1 }
  0xe0   :  { %v391_v52 = vadd.f32 %v668_v45, %v306_v48 }
  0xe1   :  { %v382_v49 = vpop.f32.mrf.mxu1 }
  0xe2   :  { %v679_v50 = vpop.f32.mrf.mxu0  ;;  %v383_v53 = vadd.f32 %v382_v49, %v299_v51 }
  0xe3   :  { %v480_v55 = vadd.f32 %v679_v50, %v391_v52 }
  0xe4   :  { %v473_v54 = vpop.f32.mrf.mxu0 }
  0xe5   :  { %v474_v58 = vadd.f32 %v473_v54, %v383_v53 }
  0xe8   :  { %v690_v57 = vpop.f32.mrf.mxu1 }
  0xe9   :  { %v561_v59 = vadd.f32 %v690_v57, %v480_v55 }
  0xea   :  { %v554_v61 = vpop.f32.mrf.mxu1 }
  0xeb   :  { %v565_v62 = vadd.f32 %v561_v59, %v22_v56  ;;  %v555_v63 = vadd.f32 %v554_v61, %v474_v58 }
  0xed   :  { %567 = vst.msk [vmem:[#allocation2 + $0x8] sm:$0xff] %vm18_vm0, %v565_v62  ;;  %v564_v0 = vadd.f32 %v555_v63, %v21_v60 }
  0xef   :  { %566 = vst.msk [vmem:[#allocation2] sm:$0xff] %vm18_vm0, %v564_v0 }
  0xf4   :  { %v572_v2 = vld [vmem:[#allocation2 + $0x8] sm:$0xff] }
  0xf5   :  { %v581_v3 = vadd.f32 %v588_v1, %v572_v2 }
  0xf6   :  { %v571_v4 = vld [vmem:[#allocation2] sm:$0xff] }
  0xf7   :  { %583 = vst.msk [vmem:[%s799_s3 + $0x8] sm:$0xff] %vm18_vm0, %v581_v3  ;;  %v580_v5 = vadd.f32 %v588_v1, %v571_v4 }
  0xf9   :  { %582 = vst.msk [vmem:[%s799_s3] sm:$0xff] %vm18_vm0, %v580_v5 }

// kernel: encoder_forward.23
= control target key start
LH: loop header
LB: loop body
LE: loop exit
PB: predicated region body
PF: predicated region fallthrough
CT: control target
= control target key end

     0   :  { %s1334_s12 = smov 0   ;;  %s1405_s0 = inlined_call_operand.vmem [shape: f32[8,8,8], index: 0, kind: input, shape index: {}]   ;;  %s1406_s1 = inlined_call_operand.vmem [shape: f32[8,8,8], index: 1, kind: input, shape index: {}]   ;;  %s1407_s2 = inlined_call_operand.vmem [shape: f32[8,8,8], index: 2, kind: input, shape index: {}]   ;;  %s1408_s3 = inlined_call_operand.vmem [shape: f32[8,8,8], index: 3, kind: output, shape index: {}]  }
   0x1 LB: > { %s1195_s13 = sadd.s32 4294967295, %s1310_s12   ;;  %p1199_p0 = scmp.ge.s32.totalorder %s1310_s12, 1  ;;  %s1310_s12 = sphi %s1334_s12, %s13_s12  }
   0x2   : > { %p154_p1 = scmp.lt.s32.totalorder %s1310_s12, 9 }
   0x4   : > { %p155_p2 = pnand %p1199_p0, %p154_p1 }
   0x5   : > { %p184_p3 = scmp.lt.s32.totalorder (!%p155_p2), %s1195_s13, 7 }
   0x6   : > { %158 = sbr.rel (%p155_p2) target bundleno = 763 (0x2fb), region = 32 }
   0xb   : > { %v1312_v0 = vmov 0.0   ;;  %vm1313_vm0 = vmmov 0   ;;  %s1410_s13 = smov (!%p184_p3, %s1195_s13), 7  ;;  %vm203_vm1 = vcmask 64512  }
   0xc   : > { %1230 = vmatprep.subr.mxu0 %v1312_v0  ;;  %1232 = vmatprep.mubr.msk.f32.mxu0 %vm1313_vm0, %v1312_v0  ;;  %s1348_s14 = sshll.u32 %s1410_s13, 3 }
   0xd   : > { %1235 = vmatprep.subr.mxu1 %v1312_v0  ;;  %1237 = vmatprep.mubr.msk.f32.mxu1 %vm1313_vm0, %v1312_v0  ;;  %s191_s17 = scalar_lea.vmem %s1406_s1, %s1348_s14  ;;  %s187_s20 = scalar_lea.vmem %s1405_s0, %s1348_s14 }
   0xe   : > { %v201_v1 = vld [vmem:[%s191_s17] sm:$0xff]  ;;  %s195_s23 = scalar_lea.vmem %s1407_s2, %s1348_s14  ;;  %s199_s26 = scalar_lea.vmem %s1408_s3, %s1348_s14 }
   0xf   : > { %v200_v2 = vld [vmem:[%s187_s20] sm:$0xff]  ;;  %v208_v3 = vsel %vm203_vm1, %v201_v1, 0 }
  0x10   : > { %v205_v4 = vsel %vm203_vm1, %v200_v2, 0  ;;  %v241_v5 = vand.u32 4294901760, %v208_v3  ;;  %v202_v39 = vld [vmem:[%s195_s23] sm:$0xff] }
  0x11   : > { %v276_v6 = vand.u32 4294901760, %v205_v4  ;;  %v702_v40 = vand.u32 4294901760, %v202_v39 }
  0x12   : > { %1231 = vmatpush3.xpose.msra.mxu0 %v241_v5  ;;  %v318_v8 = vsub.f32 %v208_v3, %v241_v5 }
  0x13   : > { %v277_v7 = vsub.f32 %v205_v4, %v276_v6  ;;  %1240 = vmatprep.subr.mxu0 %v1312_v0  ;;  %v779_v41 = vsub.f32 %v202_v39, %v702_v40 }
  0x14   : > { %v319_v10 = vand.u32 4294901760, %v318_v8 }
  0x15   : > { %v278_v9 = vand.u32 4294901760, %v277_v7  ;;  %v780_v42 = vand.u32 4294901760, %v779_v41 }
  0x16   : > { %v320_v12 = vsub.f32 %v318_v8, %v319_v10 }
  0x17   : > { %v279_v11 = vsub.f32 %v277_v7, %v278_v9  ;;  %v781_v43 = vsub.f32 %v779_v41, %v780_v42 }
  0x18   : > { %v321_v14 = vand.u32 4294901760, %v320_v12 }
  0x19   : > { %v280_v13 = vand.u32 4294901760, %v279_v11  ;;  %v782_v44 = vand.u32 4294901760, %v781_v43 }
  0x1a   : > { %1236 = vmatpush3.xpose.msra.mxu1 %v321_v14 }
  0x1b   : > { %1233 = vmatmul.mubr.f32.vlgmr.msra.gmra.mxu0 %v280_v13  ;;  %1245 = vmatprep.subr.mxu1 %v1312_v0 }
  0x1c   : > { %1241 = vmatpush3.xpose.msra.mxu0 %v318_v8  ;;  %1242 = vmatprep.mubr.msk.f32.mxu0 %vm1313_vm0, %v1312_v0 }
  0x1d   : > { %1250 = vmatprep.subr.mxu0 %v1312_v0  ;;  %1238 = vmatmul.mubr.f32.vlgmr.msra.gmra.mxu1 %v276_v6 }
  0x1e   : > { %1246 = vmatpush3.xpose.msra.mxu1 %v241_v5  ;;  %1247 = vmatprep.mubr.msk.f32.mxu1 %vm1313_vm0, %v1312_v0 }
  0x1f   : > { %1243 = vmatmul.mubr.f32.vlgmr.msra.gmra.mxu0 %v277_v7  ;;  %1255 = vmatprep.subr.mxu1 %v1312_v0 }
  0x20   : > { %1251 = vmatpush3.xpose.msra.mxu0 %v319_v10  ;;  %1252 = vmatprep.mubr.msk.f32.mxu0 %vm1313_vm0, %v1312_v0 }
  0x21   : > { %1248 = vmatmul.mubr.f32.vlgmr.msra.gmra.mxu1 %v278_v9  ;;  %1260 = vmatprep.subr.mxu0 %v1312_v0 }
  0x22   : > { %1256 = vmatpush3.xpose.msra.mxu1 %v241_v5  ;;  %1257 = vmatprep.mubr.msk.f32.mxu1 %vm1313_vm0, %v1312_v0 }
  0x23   : > { %1253 = vmatmul.mubr.f32.vlgmr.msra.gmra.mxu0 %v276_v6  ;;  %1265 = vmatprep.subr.mxu1 %v1312_v0 }
  0x24   : > { %1262 = vmatprep.mubr.msk.f32.mxu0 %vm1313_vm0, %v1312_v0  ;;  %1261 = vmatpush3.msra.mxu0 %v702_v40 }
  0x25   : > { %1258 = vmatmul.mubr.f32.vlgmr.msra.gmra.mxu1 %v276_v6  ;;  %1270 = vmatprep.subr.mxu0 %v1312_v0 }
  0x26   : > { %1267 = vmatprep.mubr.msk.f32.mxu1 %vm1313_vm0, %v1312_v0  ;;  %1266 = vmatpush3.msra.mxu1 %v782_v44 }
  0x27   : > { %1275 = vmatprep.subr.mxu1 %v1312_v0 }
  0xdb   : > { %v282_v15 = vpop.f32.mrf.mxu0 }
  0xdd   : > { %v1234_v16 = vpop.f32.mrf.mxu0  ;;  %v358_v17 = vpop.f32.mrf.mxu1 }
  0xde   : > { %v359_v18 = vadd.f32 %v358_v17, %v282_v15 }
  0xdf   : > { %v432_v19 = vpop.f32.mrf.mxu0  ;;  %v1239_v20 = vpop.f32.mrf.mxu1 }
  0xe0   : > { %v433_v21 = vadd.f32 %v432_v19, %v359_v18 }
  0xe1   : > { %v1244_v22 = vpop.f32.mrf.mxu0  ;;  %v506_v23 = vpop.f32.mrf.mxu1 }
  0xe2   : > { %v507_v24 = vadd.f32 %v506_v23, %v433_v21 }
  0xe3   : > { %v580_v25 = vpop.f32.mrf.mxu0  ;;  %v1249_v26 = vpop.f32.mrf.mxu1 }
  0xe4   : > { %v581_v27 = vadd.f32 %v580_v25, %v507_v24 }
  0xe5   : > { %v1254_v28 = vpop.f32.mrf.mxu0  ;;  %v652_v29 = vpop.f32.mrf.mxu1 }
  0xe6   : > { %v653_v30 = vadd.f32 %v652_v29, %v581_v27 }
  0xe7   : > { %v1259_v31 = vpop.f32.mrf.mxu1 }
  0xe8   : > { %v656_v32 = vmul.f32 0.35355338, %v653_v30 }
  0xea   : > { %v657_v33 = vsel %vm203_vm1, %v656_v32, -inf }
  0xeb   : > { %658 = vmax.xlane.f32.xlu0 %v657_v33 }
 0x174   : > { %v659_v34 = vpop.xlane.xlu0 %658 }
 0x175   : > { %v660_v35 = vsub.f32 %v656_v32, %v659_v34 }
 0x177   : > { %v661_v36 = vmul.f32 1.442695, %v660_v35 }
 0x179   : > { %1300 = vpow2.f32 %v661_v36 }
 0x186   : > { %v1301_v37 = vpop.eup %1300 }
 0x187   : > { %v663_v38 = vsel %vm203_vm1, %v1301_v37, 0.0 }
 0x188   : > { %664 = vadd.xlane.f32.xlu0 %v663_v38 }
 0x211   : > { %v665_v45 = vpop.xlane.xlu0 %664 }
 0x212   : > { %1302 = vrcp.f32 %v665_v45 }
 0x21f   : > { %v1303_v46 = vpop.eup %1302 }
 0x220   : > { %v667_v47 = vmul.f32 %v1303_v46, %v1301_v37 }
 0x222   : > { %v669_v48 = vsel %vm203_vm1, %v667_v47, 0 }
 0x223   : > { %v737_v49 = vand.u32 4294901760, %v669_v48 }
 0x225   : > { %v738_v50 = vsub.f32 %v669_v48, %v737_v49  ;;  %1268 = vmatmul.mubr.f32.vlgmr.msra.gmra.mxu1 %v737_v49 }
 0x226   : > { %1276 = vmatpush3.msra.mxu1 %v702_v40  ;;  %1277 = vmatprep.mubr.msk.f32.mxu1 %vm1313_vm0, %v1312_v0 }
 0x227   : > { %v739_v51 = vand.u32 4294901760, %v738_v50  ;;  %1285 = vmatprep.subr.mxu1 %v1312_v0 }
 0x229   : > { %1278 = vmatmul.mubr.f32.vlgmr.msra.gmra.mxu1 %v739_v51  ;;  %v740_v52 = vsub.f32 %v738_v50, %v739_v51 }
 0x22a   : > { %1286 = vmatpush3.msra.mxu1 %v702_v40  ;;  %1287 = vmatprep.mubr.msk.f32.mxu1 %vm1313_vm0, %v1312_v0 }
 0x22b   : > { %v741_v53 = vand.u32 4294901760, %v740_v52 }
 0x22d   : > { %1263 = vmatmul.mubr.f32.vlgmr.msra.gmra.mxu0 %v741_v53  ;;  %1288 = vmatmul.mubr.f32.vlgmr.msra.gmra.mxu1 %v737_v49 }
 0x22e   : > { %1271 = vmatpush3.msra.mxu0 %v779_v41  ;;  %1272 = vmatprep.mubr.msk.f32.mxu0 %vm1313_vm0, %v1312_v0 }
 0x22f   : > { %1280 = vmatprep.subr.mxu0 %v1312_v0 }
 0x231   : > { %1273 = vmatmul.mubr.f32.vlgmr.msra.gmra.mxu0 %v738_v50 }
 0x232   : > { %1281 = vmatpush3.msra.mxu0 %v780_v42  ;;  %1282 = vmatprep.mubr.msk.f32.mxu0 %vm1313_vm0, %v1312_v0 }
 0x235   : > { %1283 = vmatmul.mubr.f32.vlgmr.msra.gmra.mxu0 %v737_v49 }
 0x2e5   : > { %v819_v54 = vpop.f32.mrf.mxu1 }
 0x2e7   : > { %v1269_v55 = vpop.f32.mrf.mxu1 }
 0x2e9   : > { %v967_v56 = vpop.f32.mrf.mxu1 }
 0x2eb   : > { %v1279_v57 = vpop.f32.mrf.mxu1 }
 0x2ed   : > { %v743_v58 = vpop.f32.mrf.mxu0  ;;  %v1113_v59 = vpop.f32.mrf.mxu1 }
 0x2ee   : > { %v820_v62 = vadd.f32 %v819_v54, %v743_v58 }
 0x2ef   : > { %v1264_v60 = vpop.f32.mrf.mxu0  ;;  %v1289_v61 = vpop.f32.mrf.mxu1 }
 0x2f1   : > { %v893_v63 = vpop.f32.mrf.mxu0 }
 0x2f2   : > { %v894_v1 = vadd.f32 %v893_v63, %v820_v62 }
 0x2f3   : > { %v1274_v2 = vpop.f32.mrf.mxu0 }
 0x2f4   : > { %v968_v3 = vadd.f32 %v967_v56, %v894_v1 }
 0x2f5   : > { %v1041_v4 = vpop.f32.mrf.mxu0 }
 0x2f6   : > { %v1042_v5 = vadd.f32 %v1041_v4, %v968_v3 }
 0x2f7   : > { %v1284_v0 = vpop.f32.mrf.mxu0 }
 0x2f8   : > { %v1114_v6 = vadd.f32 %v1113_v59, %v1042_v5 }
 0x2fa   : > { %1117 = vst.msk [vmem:[%s199_s26] sm:$0xff] %vm203_vm1, %v1114_v6 }
 0x2fb PF: > { %s13_s12 = sadd.s32 1, %s1310_s12  }
 0x2fc   : > { %p10_p4 = scmp.ge.s32.totalorder %s13_s12, 10  }
 0x2fe   :  { %12 = sbr.rel (!%p10_p4) target bundleno = 1 (0x1), region = 68 }

// kernel: encoder_forward.24
= control target key start
LH: loop header
LB: loop body
LE: loop exit
PB: predicated region body
PF: predicated region fallthrough
CT: control target
= control target key end

     0   :  { %vm21_vm0 = vcmask 261120   ;;  %v699_v38 = vmov 0.0   ;;  %s814_s1 = inlined_call_operand.vmem [shape: f32[32,32], index: 1, kind: input, shape index: {}]   ;;  %s815_s0 = inlined_call_operand.vmem [shape: f32[16,32], index: 0, kind: input, shape index: {}]   ;;  %s816_s2 = inlined_call_operand.vmem [shape: f32[1,32], index: 2, kind: input, shape index: {}]   ;;  %s817_s3 = inlined_call_operand.vmem [shape: f32[16,32], index: 3, kind: input, shape index: {}]   ;;  %s818_s4 = inlined_call_operand.vmem [shape: f32[16,32], index: 4, kind: output, shape index: {}]  }
   0x1   :  { %v31_v0 = vld [vmem:[%s814_s1 + $0x18] sm:$0xff]  ;;  %v30_v1 = vld [vmem:[%s814_s1 + $0x10] sm:$0xff]  ;;  %v29_v2 = vld [vmem:[%s814_s1 + $0x8] sm:$0xff]  ;;  %23 = vst.msk [vmem:[#allocation2 + $0x8] sm:$0xff] %vm21_vm0, %v699_v38 }
   0x2   :  { %v734_v3 = vand.u32 4294901760, %v31_v0  ;;  %v736_v4 = vand.u32 4294901760, %v30_v1  ;;  %v738_v5 = vand.u32 4294901760, %v29_v2  ;;  %v28_v6 = vld [vmem:[%s814_s1] sm:$0xff]  ;;  %v27_v8 = vld [vmem:[%s815_s0 + $0x8] sm:$0xff]  ;;  %22 = vst.msk [vmem:[#allocation2] sm:$0xff] %vm21_vm0, %v699_v38 }
   0x3   :  { %v26_v7 = vld [vmem:[%s815_s0] sm:$0xff]  ;;  %v749_v9 = vand.u32 4294901760, %v28_v6  ;;  %v37_v11 = vsel %vm21_vm0, %v27_v8, 0 }
   0x4   :  { %v34_v10 = vsel %vm21_vm0, %v26_v7, 0  ;;  %632 = vmatprep.subr.mxu0 %v734_v3  ;;  %v154_v12 = vsub.f32 %v31_v0, %v734_v3  ;;  %v161_v14 = vsub.f32 %v30_v1, %v736_v4  ;;  %v758_v15 = vand.u32 4294901760, %v37_v11  ;;  %v595_v1 = vld [vmem:[%s816_s2] ss:$0 sm:$0xff] }
   0x5   :  { %v755_v13 = vand.u32 4294901760, %v34_v10  ;;  %633 = vmatpush3.msra.mxu0 %v734_v3  ;;  %v168_v16 = vsub.f32 %v29_v2, %v738_v5  ;;  %v175_v17 = vsub.f32 %v28_v6, %v749_v9  ;;  %v585_v6 = vld [vmem:[%s817_s3] sm:$0xff] }
   0x6   :  { %634 = vmatprep.subr.mxu0 %v736_v4  ;;  %v155_v18 = vand.u32 4294901760, %v154_v12  ;;  %v162_v20 = vand.u32 4294901760, %v161_v14  ;;  %v119_v21 = vsub.f32 %v37_v11, %v758_v15 }
   0x7   :  { %v109_v19 = vsub.f32 %v34_v10, %v755_v13  ;;  %651 = vmatprep.mubr.f32.mxu1 %v755_v13  ;;  %635 = vmatpush3.msra.mxu0 %v736_v4  ;;  %v169_v22 = vand.u32 4294901760, %v168_v16  ;;  %v176_v23 = vand.u32 4294901760, %v175_v17 }
   0x8   :  { %636 = vmatprep.subr.mxu0 %v738_v5  ;;  %v156_v24 = vsub.f32 %v154_v12, %v155_v18  ;;  %v163_v26 = vsub.f32 %v161_v14, %v162_v20  ;;  %v120_v27 = vand.u32 4294901760, %v119_v21  ;;  %v25_v56 = vld [vmem:[#allocation2 + $0x8] sm:$0xff] }
   0x9   :  { %v110_v25 = vand.u32 4294901760, %v109_v19  ;;  %637 = vmatpush3.msra.mxu0 %v738_v5  ;;  %v170_v28 = vsub.f32 %v168_v16, %v169_v22  ;;  %v177_v29 = vsub.f32 %v175_v17, %v176_v23  ;;  %v24_v60 = vld [vmem:[#allocation2] sm:$0xff] }
   0xa   :  { %638 = vmatprep.subr.mxu0 %v749_v9  ;;  %v157_v30 = vand.u32 4294901760, %v156_v24  ;;  %v164_v32 = vand.u32 4294901760, %v163_v26  ;;  %v121_v33 = vsub.f32 %v119_v21, %v120_v27 }
   0xb   :  { %v111_v31 = vsub.f32 %v109_v19, %v110_v25  ;;  %639 = vmatpush3.msra.mxu0 %v749_v9  ;;  %v171_v36 = vand.u32 4294901760, %v170_v28  ;;  %v178_v37 = vand.u32 4294901760, %v177_v29 }
   0xc   :  { %643 = vmatprep.subr.mxu1 %v157_v30  ;;  %654 = vmatprep.subr.mxu0 %v154_v12  ;;  %v122_v35 = vand.u32 4294901760, %v121_v33 }
   0xd   :  { %v112_v34 = vand.u32 4294901760, %v111_v31  ;;  %644 = vmatpush3.msra.mxu1 %v157_v30 }
   0xe   :  { %645 = vmatprep.subr.mxu1 %v164_v32 }
   0xf   :  { %640 = vmatprep.mubr.f32.mxu0 %v112_v34  ;;  %646 = vmatpush3.msra.mxu1 %v164_v32 }
  0x10   :  { %641 = vmatmul.mubr.f32.vlgmr.msra.gmra.mxu0 %v122_v35  ;;  %647 = vmatprep.subr.mxu1 %v171_v36 }
  0x11   :  { %655 = vmatpush3.msra.mxu0 %v154_v12  ;;  %648 = vmatpush3.msra.mxu1 %v171_v36 }
  0x12   :  { %656 = vmatprep.subr.mxu0 %v161_v14  ;;  %649 = vmatprep.subr.mxu1 %v178_v37 }
  0x13   :  { %657 = vmatpush3.msra.mxu0 %v161_v14  ;;  %650 = vmatpush3.msra.mxu1 %v178_v37 }
  0x14   :  { %658 = vmatprep.subr.mxu0 %v168_v16  ;;  %652 = vmatmul.mubr.f32.vlgmr.msra.gmra.mxu1 %v758_v15 }
  0x15   :  { %659 = vmatpush3.msra.mxu0 %v168_v16  ;;  %665 = vmatprep.subr.mxu1 %v734_v3 }
  0x16   :  { %660 = vmatprep.subr.mxu0 %v175_v17  ;;  %662 = vmatprep.mubr.f32.mxu0 %v109_v19 }
  0x17   :  { %661 = vmatpush3.msra.mxu0 %v175_v17  ;;  %666 = vmatpush3.msra.mxu1 %v734_v3 }
  0x18   :  { %663 = vmatmul.mubr.f32.vlgmr.msra.gmra.mxu0 %v119_v21  ;;  %667 = vmatprep.subr.mxu1 %v736_v4 }
  0x19   :  { %676 = vmatprep.subr.mxu0 %v155_v18  ;;  %668 = vmatpush3.msra.mxu1 %v736_v4 }
  0x1a   :  { %677 = vmatpush3.msra.mxu0 %v155_v18  ;;  %669 = vmatprep.subr.mxu1 %v738_v5 }
  0x1b   :  { %678 = vmatprep.subr.mxu0 %v162_v20  ;;  %670 = vmatpush3.msra.mxu1 %v738_v5 }
  0x1c   :  { %679 = vmatpush3.msra.mxu0 %v162_v20  ;;  %671 = vmatprep.subr.mxu1 %v749_v9 }
  0x1d   :  { %680 = vmatprep.subr.mxu0 %v169_v22  ;;  %672 = vmatpush3.msra.mxu1 %v749_v9 }
  0x1e   :  { %673 = vmatprep.mubr.f32.mxu1 %v110_v25  ;;  %681 = vmatpush3.msra.mxu0 %v169_v22 }
  0x1f   :  { %674 = vmatmul.mubr.f32.vlgmr.msra.gmra.mxu1 %v120_v27  ;;  %682 = vmatprep.subr.mxu0 %v176_v23 }
  0x20   :  { %687 = vmatprep.subr.mxu1 %v734_v3  ;;  %683 = vmatpush3.msra.mxu0 %v176_v23 }
  0x21   :  { %684 = vmatprep.mubr.f32.mxu0 %v755_v13  ;;  %688 = vmatpush3.msra.mxu1 %v734_v3  ;;  %v586_v3 = vld [vmem:[%s817_s3 + $0x8] sm:$0xff] }
  0x22   :  { %685 = vmatmul.mubr.f32.vlgmr.msra.gmra.mxu0 %v758_v15  ;;  %689 = vmatprep.subr.mxu1 %v736_v4 }
  0x23   :  { %695 = vmatprep.mubr.f32.mxu1 %v755_v13  ;;  %690 = vmatpush3.msra.mxu1 %v736_v4 }
  0x24   :  { %691 = vmatprep.subr.mxu1 %v738_v5 }
  0x25   :  { %692 = vmatpush3.msra.mxu1 %v738_v5 }
  0x26   :  { %693 = vmatprep.subr.mxu1 %v749_v9 }
  0x27   :  { %694 = vmatpush3.msra.mxu1 %v749_v9 }
  0x28   :  { %696 = vmatmul.mubr.f32.vlgmr.msra.gmra.mxu1 %v758_v15 }
  0xd0   :  { %v642_v39 = vpop.f32.mrf.mxu0 }
  0xd2   :  { %v114_v40 = vpop.f32.mrf.mxu0 }
  0xd4   :  { %v653_v41 = vpop.f32.mrf.mxu1 }
  0xd5   :  { %v222_v44 = vadd.f32 %v653_v41, %v642_v39 }
  0xd6   :  { %v215_v42 = vpop.f32.mrf.mxu1 }
  0xd7   :  { %v216_v46 = vadd.f32 %v215_v42, %v114_v40 }
  0xd8   :  { %v664_v43 = vpop.f32.mrf.mxu0 }
  0xd9   :  { %v309_v48 = vadd.f32 %v664_v43, %v222_v44 }
  0xda   :  { %v301_v47 = vpop.f32.mrf.mxu0 }
  0xdb   :  { %v302_v51 = vadd.f32 %v301_v47, %v216_v46 }
  0xdf   :  { %v675_v45 = vpop.f32.mrf.mxu1 }
  0xe0   :  { %v394_v52 = vadd.f32 %v675_v45, %v309_v48 }
  0xe1   :  { %v385_v49 = vpop.f32.mrf.mxu1 }
  0xe2   :  { %v686_v50 = vpop.f32.mrf.mxu0  ;;  %v386_v53 = vadd.f32 %v385_v49, %v302_v51 }
  0xe3   :  { %v483_v55 = vadd.f32 %v686_v50, %v394_v52 }
  0xe4   :  { %v476_v54 = vpop.f32.mrf.mxu0 }
  0xe5   :  { %v477_v58 = vadd.f32 %v476_v54, %v386_v53 }
  0xe8   :  { %v697_v57 = vpop.f32.mrf.mxu1 }
  0xe9   :  { %v564_v59 = vadd.f32 %v697_v57, %v483_v55 }
  0xea   :  { %v557_v61 = vpop.f32.mrf.mxu1 }
  0xeb   :  { %v568_v62 = vadd.f32 %v564_v59, %v25_v56  ;;  %v558_v63 = vadd.f32 %v557_v61, %v477_v58 }
  0xed   :  { %570 = vst.msk [vmem:[#allocation2 + $0x8] sm:$0xff] %vm21_vm0, %v568_v62  ;;  %v567_v0 = vadd.f32 %v558_v63, %v24_v60 }
  0xef   :  { %569 = vst.msk [vmem:[#allocation2] sm:$0xff] %vm21_vm0, %v567_v0 }
  0xf4   :  { %v575_v2 = vld [vmem:[#allocation2 + $0x8] sm:$0xff] }
  0xf5   :  { %v584_v4 = vadd.f32 %v595_v1, %v575_v2 }
  0xf6   :  { %v574_v5 = vld [vmem:[#allocation2] sm:$0xff] }
  0xf7   :  { %v588_v7 = vadd.f32 %v586_v3, %v584_v4  ;;  %v583_v8 = vadd.f32 %v595_v1, %v574_v5 }
  0xf9   :  { %590 = vst.msk [vmem:[%s818_s4 + $0x8] sm:$0xff] %vm21_vm0, %v588_v7  ;;  %v587_v9 = vadd.f32 %v585_v6, %v583_v8 }
  0xfb   :  { %589 = vst.msk [vmem:[%s818_s4] sm:$0xff] %vm21_vm0, %v587_v9 }

// kernel: encoder_forward.26
= control target key start
LH: loop header
LB: loop body
LE: loop exit
PB: predicated region body
PF: predicated region fallthrough
CT: control target
= control target key end

     0   :  { %vm29_vm0 = vcmask 261120   ;;  %vm18_vm1 = vcmask 523264   ;;  %v695_v38 = vmov 0.0   ;;  %s797_s1 = inlined_call_operand.vmem [shape: f32[32,64], index: 1, kind: input, shape index: {}]   ;;  %s798_s0 = inlined_call_operand.vmem [shape: f32[16,32], index: 0, kind: input, shape index: {}]   ;;  %s799_s2 = inlined_call_operand.vmem [shape: f32[1,64], index: 2, kind: input, shape index: {}]   ;;  %s800_s3 = inlined_call_operand.vmem [shape: f32[16,64], index: 3, kind: output, shape index: {}]  }
   0x1   :  { %v28_v0 = vld [vmem:[%s797_s1 + $0x18] sm:$0xff]  ;;  %v27_v1 = vld [vmem:[%s797_s1 + $0x10] sm:$0xff]  ;;  %v26_v2 = vld [vmem:[%s797_s1 + $0x8] sm:$0xff]  ;;  %20 = vst.msk [vmem:[#allocation2 + $0x8] sm:$0xff] %vm18_vm1, %v695_v38 }
   0x2   :  { %v725_v3 = vand.u32 4294901760, %v28_v0  ;;  %v727_v4 = vand.u32 4294901760, %v27_v1  ;;  %v729_v5 = vand.u32 4294901760, %v26_v2  ;;  %v25_v6 = vld [vmem:[%s797_s1] sm:$0xff]  ;;  %v24_v8 = vld [vmem:[%s798_s0 + $0x8] sm:$0xff]  ;;  %19 = vst.msk [vmem:[#allocation2] sm:$0xff] %vm18_vm1, %v695_v38 }
   0x3   :  { %v23_v7 = vld [vmem:[%s798_s0] sm:$0xff]  ;;  %v740_v9 = vand.u32 4294901760, %v25_v6  ;;  %v34_v11 = vsel %vm29_vm0, %v24_v8, 0 }
   0x4   :  { %v31_v10 = vsel %vm29_vm0, %v23_v7, 0  ;;  %628 = vmatprep.subr.mxu0 %v725_v3  ;;  %v151_v12 = vsub.f32 %v28_v0, %v725_v3  ;;  %v746_v14 = vand.u32 4294901760, %v34_v11  ;;  %v158_v15 = vsub.f32 %v27_v1, %v727_v4  ;;  %v591_v1 = vld [vmem:[%s799_s2] ss:$0 sm:$0xff] }
   0x5   :  { %v744_v13 = vand.u32 4294901760, %v31_v10  ;;  %629 = vmatpush3.msra.mxu0 %v725_v3  ;;  %v165_v16 = vsub.f32 %v26_v2, %v729_v5  ;;  %v172_v17 = vsub.f32 %v25_v6, %v740_v9 }
   0x6   :  { %630 = vmatprep.subr.mxu0 %v727_v4  ;;  %v152_v18 = vand.u32 4294901760, %v151_v12  ;;  %v159_v20 = vand.u32 4294901760, %v158_v15  ;;  %v116_v21 = vsub.f32 %v34_v11, %v746_v14 }
   0x7   :  { %v106_v19 = vsub.f32 %v31_v10, %v744_v13  ;;  %647 = vmatprep.mubr.f32.mxu1 %v744_v13  ;;  %631 = vmatpush3.msra.mxu0 %v727_v4  ;;  %v166_v22 = vand.u32 4294901760, %v165_v16  ;;  %v173_v23 = vand.u32 4294901760, %v172_v17 }
   0x8   :  { %632 = vmatprep.subr.mxu0 %v729_v5  ;;  %v153_v24 = vsub.f32 %v151_v12, %v152_v18  ;;  %v160_v26 = vsub.f32 %v158_v15, %v159_v20  ;;  %v117_v27 = vand.u32 4294901760, %v116_v21  ;;  %v22_v56 = vld [vmem:[#allocation2 + $0x8] sm:$0xff] }
   0x9   :  { %v107_v25 = vand.u32 4294901760, %v106_v19  ;;  %633 = vmatpush3.msra.mxu0 %v729_v5  ;;  %v167_v28 = vsub.f32 %v165_v16, %v166_v22  ;;  %v174_v29 = vsub.f32 %v172_v17, %v173_v23  ;;  %v21_v60 = vld [vmem:[#allocation2] sm:$0xff] }
   0xa   :  { %634 = vmatprep.subr.mxu0 %v740_v9  ;;  %v154_v30 = vand.u32 4294901760, %v153_v24  ;;  %v161_v32 = vand.u32 4294901760, %v160_v26  ;;  %v118_v33 = vsub.f32 %v116_v21, %v117_v27 }
   0xb   :  { %v108_v31 = vsub.f32 %v106_v19, %v107_v25  ;;  %635 = vmatpush3.msra.mxu0 %v740_v9  ;;  %v168_v36 = vand.u32 4294901760, %v167_v28  ;;  %v175_v37 = vand.u32 4294901760, %v174_v29 }
   0xc   :  { %639 = vmatprep.subr.mxu1 %v154_v30  ;;  %650 = vmatprep.subr.mxu0 %v151_v12  ;;  %v119_v35 = vand.u32 4294901760, %v118_v33 }
   0xd   :  { %v109_v34 = vand.u32 4294901760, %v108_v31  ;;  %640 = vmatpush3.msra.mxu1 %v154_v30 }
   0xe   :  { %641 = vmatprep.subr.mxu1 %v161_v32 }
   0xf   :  { %636 = vmatprep.mubr.f32.mxu0 %v109_v34  ;;  %642 = vmatpush3.msra.mxu1 %v161_v32 }
  0x10   :  { %637 = vmatmul.mubr.f32.vlgmr.msra.gmra.mxu0 %v119_v35  ;;  %643 = vmatprep.subr.mxu1 %v168_v36 }
  0x11   :  { %651 = vmatpush3.msra.mxu0 %v151_v12  ;;  %644 = vmatpush3.msra.mxu1 %v168_v36 }
  0x12   :  { %652 = vmatprep.subr.mxu0 %v158_v15  ;;  %645 = vmatprep.subr.mxu1 %v175_v37 }
  0x13   :  { %653 = vmatpush3.msra.mxu0 %v158_v15  ;;  %646 = vmatpush3.msra.mxu1 %v175_v37 }
  0x14   :  { %654 = vmatprep.subr.mxu0 %v165_v16  ;;  %648 = vmatmul.mubr.f32.vlgmr.msra.gmra.mxu1 %v746_v14 }
  0x15   :  { %655 = vmatpush3.msra.mxu0 %v165_v16  ;;  %661 = vmatprep.subr.mxu1 %v725_v3 }
  0x16   :  { %656 = vmatprep.subr.mxu0 %v172_v17  ;;  %658 = vmatprep.mubr.f32.mxu0 %v106_v19 }
  0x17   :  { %657 = vmatpush3.msra.mxu0 %v172_v17  ;;  %662 = vmatpush3.msra.mxu1 %v725_v3 }
  0x18   :  { %659 = vmatmul.mubr.f32.vlgmr.msra.gmra.mxu0 %v116_v21  ;;  %663 = vmatprep.subr.mxu1 %v727_v4 }
  0x19   :  { %672 = vmatprep.subr.mxu0 %v152_v18  ;;  %664 = vmatpush3.msra.mxu1 %v727_v4 }
  0x1a   :  { %673 = vmatpush3.msra.mxu0 %v152_v18  ;;  %665 = vmatprep.subr.mxu1 %v729_v5 }
  0x1b   :  { %674 = vmatprep.subr.mxu0 %v159_v20  ;;  %666 = vmatpush3.msra.mxu1 %v729_v5 }
  0x1c   :  { %675 = vmatpush3.msra.mxu0 %v159_v20  ;;  %667 = vmatprep.subr.mxu1 %v740_v9 }
  0x1d   :  { %676 = vmatprep.subr.mxu0 %v166_v22  ;;  %668 = vmatpush3.msra.mxu1 %v740_v9 }
  0x1e   :  { %669 = vmatprep.mubr.f32.mxu1 %v107_v25  ;;  %677 = vmatpush3.msra.mxu0 %v166_v22 }
  0x1f   :  { %670 = vmatmul.mubr.f32.vlgmr.msra.gmra.mxu1 %v117_v27  ;;  %678 = vmatprep.subr.mxu0 %v173_v23 }
  0x20   :  { %683 = vmatprep.subr.mxu1 %v725_v3  ;;  %679 = vmatpush3.msra.mxu0 %v173_v23 }
  0x21   :  { %680 = vmatprep.mubr.f32.mxu0 %v744_v13  ;;  %684 = vmatpush3.msra.mxu1 %v725_v3 }
  0x22   :  { %681 = vmatmul.mubr.f32.vlgmr.msra.gmra.mxu0 %v746_v14  ;;  %685 = vmatprep.subr.mxu1 %v727_v4 }
  0x23   :  { %691 = vmatprep.mubr.f32.mxu1 %v744_v13  ;;  %686 = vmatpush3.msra.mxu1 %v727_v4 }
  0x24   :  { %687 = vmatprep.subr.mxu1 %v729_v5 }
  0x25   :  { %688 = vmatpush3.msra.mxu1 %v729_v5 }
  0x26   :  { %689 = vmatprep.subr.mxu1 %v740_v9 }
  0x27   :  { %690 = vmatpush3.msra.mxu1 %v740_v9 }
  0x28   :  { %692 = vmatmul.mubr.f32.vlgmr.msra.gmra.mxu1 %v746_v14 }
  0xd0   :  { %v638_v39 = vpop.f32.mrf.mxu0 }
  0xd2   :  { %v111_v40 = vpop.f32.mrf.mxu0 }
  0xd4   :  { %v649_v41 = vpop.f32.mrf.mxu1 }
  0xd5   :  { %v219_v44 = vadd.f32 %v649_v41, %v638_v39 }
  0xd6   :  { %v212_v42 = vpop.f32.mrf.mxu1 }
  0xd7   :  { %v213_v46 = vadd.f32 %v212_v42, %v111_v40 }
  0xd8   :  { %v660_v43 = vpop.f32.mrf.mxu0 }
  0xd9   :  { %v306_v48 = vadd.f32 %v660_v43, %v219_v44 }
  0xda   :  { %v298_v47 = vpop.f32.mrf.mxu0 }
  0xdb   :  { %v299_v51 = vadd.f32 %v298_v47, %v213_v46 }
  0xdf   :  { %v671_v45 = vpop.f32.mrf.mxu1 }
  0xe0   :  { %v391_v52 = vadd.f32 %v671_v45, %v306_v48 }
  0xe1   :  { %v382_v49 = vpop.f32.mrf.mxu1 }
  0xe2   :  { %v682_v50 = vpop.f32.mrf.mxu0  ;;  %v383_v53 = vadd.f32 %v382_v49, %v299_v51 }
  0xe3   :  { %v480_v55 = vadd.f32 %v682_v50, %v391_v52 }
  0xe4   :  { %v473_v54 = vpop.f32.mrf.mxu0 }
  0xe5   :  { %v474_v58 = vadd.f32 %v473_v54, %v383_v53 }
  0xe8   :  { %v693_v57 = vpop.f32.mrf.mxu1 }
  0xe9   :  { %v561_v59 = vadd.f32 %v693_v57, %v480_v55 }
  0xea   :  { %v554_v61 = vpop.f32.mrf.mxu1 }
  0xeb   :  { %v565_v62 = vadd.f32 %v561_v59, %v22_v56  ;;  %v555_v63 = vadd.f32 %v554_v61, %v474_v58 }
  0xed   :  { %568 = vst.msk [vmem:[#allocation2 + $0x8] sm:$0xff] %vm18_vm1, %v565_v62  ;;  %v564_v0 = vadd.f32 %v555_v63, %v21_v60 }
  0xef   :  { %567 = vst.msk [vmem:[#allocation2] sm:$0xff] %vm18_vm1, %v564_v0 }
  0xf4   :  { %v573_v2 = vld [vmem:[#allocation2 + $0x8] sm:$0xff] }
  0xf5   :  { %v582_v3 = vadd.f32 %v591_v1, %v573_v2 }
  0xf6   :  { %v572_v4 = vld [vmem:[#allocation2] sm:$0xff] }
  0xf7   :  { %v584_v5 = vmax.f32 %v582_v3, 0.0  ;;  %v581_v6 = vadd.f32 %v591_v1, %v572_v4 }
  0xf9   :  { %586 = vst.msk [vmem:[%s800_s3 + $0x8] sm:$0xff] %vm18_vm1, %v584_v5  ;;  %v583_v7 = vmax.f32 %v581_v6, 0.0 }
  0xfb   :  { %585 = vst.msk [vmem:[%s800_s3] sm:$0xff] %vm18_vm1, %v583_v7 }

// kernel: encoder_forward.27
= control target key start
LH: loop header
LB: loop body
LE: loop exit
PB: predicated region body
PF: predicated region fallthrough
CT: control target
= control target key end

     0   :  { %vm36_vm0 = vcmask 523264   ;;  %vm21_vm1 = vcmask 261120   ;;  %v828_v62 = vmov 0.0   ;;  %s1085_s1 = inlined_call_operand.vmem [shape: f32[64,32], index: 1, kind: input, shape index: {}]   ;;  %s1086_s0 = inlined_call_operand.vmem [shape: f32[16,64], index: 0, kind: input, shape index: {}]   ;;  %s1087_s2 = inlined_call_operand.vmem [shape: f32[1,32], index: 2, kind: input, shape index: {}]   ;;  %s1088_s3 = inlined_call_operand.vmem [shape: f32[16,32], index: 3, kind: input, shape index: {}]   ;;  %s1089_s4 = inlined_call_operand.vmem [shape: f32[16,32], index: 4, kind: output, shape index: {}]  }
   0x1   :  { %v35_v0 = vld [vmem:[%s1085_s1 + $0x38] sm:$0xff]  ;;  %v34_v1 = vld [vmem:[%s1085_s1 + $0x30] sm:$0xff]  ;;  %v33_v2 = vld [vmem:[%s1085_s1 + $0x28] sm:$0xff]  ;;  %23 = vst.msk [vmem:[#allocation2 + $0x8] sm:$0xff] %vm21_vm1, %v828_v62 }
   0x2   :  { %v863_v3 = vand.u32 4294901760, %v35_v0  ;;  %v865_v4 = vand.u32 4294901760, %v34_v1  ;;  %v867_v5 = vand.u32 4294901760, %v33_v2  ;;  %v32_v6 = vld [vmem:[%s1085_s1 + $0x20] sm:$0xff]  ;;  %v31_v7 = vld [vmem:[%s1085_s1 + $0x18] sm:$0xff]  ;;  %v30_v8 = vld [vmem:[%s1085_s1 + $0x10] sm:$0xff] }
   0x3   :  { %v878_v9 = vand.u32 4294901760, %v32_v6  ;;  %v880_v10 = vand.u32 4294901760, %v31_v7  ;;  %v882_v11 = vand.u32 4294901760, %v30_v8  ;;  %v29_v12 = vld [vmem:[%s1085_s1 + $0x8] sm:$0xff]  ;;  %v28_v13 = vld [vmem:[%s1085_s1] sm:$0xff]  ;;  %22 = vst.msk [vmem:[#allocation2] sm:$0xff] %vm21_vm1, %v828_v62 }
   0x4   :  { %v26_v14 = vld [vmem:[%s1086_s0] sm:$0xff]  ;;  %713 = vmatprep.subr.mxu0 %v863_v3  ;;  %v895_v15 = vsub.f32 %v35_v0, %v863_v3  ;;  %v898_v16 = vsub.f32 %v34_v1, %v865_v4  ;;  %v900_v17 = vand.u32 4294901760, %v29_v12  ;;  %v903_v18 = vsub.f32 %v33_v2, %v867_v5  ;;  %v27_v19 = vld [vmem:[%s1086_s0 + $0x8] sm:$0xff] }
   0x5   :  { %714 = vmatpush3.msra.mxu0 %v863_v3  ;;  %v909_v20 = vand.u32 4294901760, %v28_v13  ;;  %v912_v21 = vsub.f32 %v32_v6, %v878_v9  ;;  %v38_v22 = vsel %vm36_vm0, %v26_v14, 0  ;;  %v41_v23 = vsel %vm36_vm0, %v27_v19, 0 }
   0x6   :  { %715 = vmatprep.subr.mxu0 %v865_v4  ;;  %v918_v24 = vand.u32 4294901760, %v895_v15  ;;  %v921_v25 = vand.u32 4294901760, %v898_v16  ;;  %v924_v26 = vand.u32 4294901760, %v903_v18  ;;  %v926_v27 = vand.u32 4294901760, %v38_v22 }
   0x7   :  { %716 = vmatpush3.msra.mxu0 %v865_v4  ;;  %v930_v28 = vand.u32 4294901760, %v912_v21  ;;  %v932_v29 = vand.u32 4294901760, %v41_v23  ;;  %v935_v30 = vsub.f32 %v31_v7, %v880_v10  ;;  %v938_v31 = vsub.f32 %v30_v8, %v882_v11 }
   0x8   :  { %717 = vmatprep.subr.mxu0 %v867_v5  ;;  %v156_v32 = vsub.f32 %v895_v15, %v918_v24  ;;  %v163_v33 = vsub.f32 %v898_v16, %v921_v25  ;;  %v170_v34 = vsub.f32 %v903_v18, %v924_v26  ;;  %v948_v35 = vsub.f32 %v38_v22, %v926_v27 }
   0x9   :  { %718 = vmatpush3.msra.mxu0 %v867_v5  ;;  %v952_v36 = vand.u32 4294901760, %v935_v30  ;;  %v955_v37 = vsub.f32 %v41_v23, %v932_v29  ;;  %748 = vmatprep.mubr.f32.mxu1 %v926_v27  ;;  %v177_v40 = vsub.f32 %v912_v21, %v930_v28  ;;  %v967_v44 = vand.u32 4294901760, %v938_v31 }
   0xa   :  { %719 = vmatprep.subr.mxu0 %v878_v9  ;;  %v157_v38 = vand.u32 4294901760, %v156_v32  ;;  %v164_v39 = vand.u32 4294901760, %v163_v33  ;;  %v118_v41 = vand.u32 4294901760, %v948_v35  ;;  %v171_v45 = vand.u32 4294901760, %v170_v34 }
   0xb   :  { %720 = vmatpush3.msra.mxu0 %v878_v9  ;;  %v184_v42 = vsub.f32 %v935_v30, %v952_v36  ;;  %v128_v43 = vand.u32 4294901760, %v955_v37  ;;  %v196_v47 = vsub.f32 %v29_v12, %v900_v17  ;;  %v203_v48 = vsub.f32 %v28_v13, %v909_v20 }
   0xc   :  { %721 = vmatprep.subr.mxu0 %v880_v10  ;;  %732 = vmatprep.subr.mxu1 %v157_v38  ;;  %v119_v46 = vsub.f32 %v948_v35, %v118_v41  ;;  %v178_v50 = vand.u32 4294901760, %v177_v40  ;;  %v191_v52 = vsub.f32 %v938_v31, %v967_v44 }
   0xd   :  { %722 = vmatpush3.msra.mxu0 %v880_v10  ;;  %733 = vmatpush3.msra.mxu1 %v157_v38  ;;  %v129_v49 = vsub.f32 %v955_v37, %v128_v43  ;;  %v980_v51 = vand.u32 4294901760, %v196_v47  ;;  %v985_v53 = vand.u32 4294901760, %v203_v48  ;;  %v185_v55 = vand.u32 4294901760, %v184_v42 }
   0xe   :  { %723 = vmatprep.subr.mxu0 %v882_v11  ;;  %734 = vmatprep.subr.mxu1 %v164_v39  ;;  %v120_v54 = vand.u32 4294901760, %v119_v46  ;;  %v192_v58 = vand.u32 4294901760, %v191_v52 }
   0xf   :  { %724 = vmatpush3.msra.mxu0 %v882_v11  ;;  %735 = vmatpush3.msra.mxu1 %v164_v39  ;;  %v130_v56 = vand.u32 4294901760, %v129_v49  ;;  %v198_v57 = vsub.f32 %v196_v47, %v980_v51  ;;  %v205_v59 = vsub.f32 %v203_v48, %v985_v53 }
  0x10   :  { %725 = vmatprep.subr.mxu0 %v900_v17  ;;  %736 = vmatprep.subr.mxu1 %v171_v45 }
  0x11   :  { %726 = vmatpush3.msra.mxu0 %v900_v17  ;;  %737 = vmatpush3.msra.mxu1 %v171_v45  ;;  %v199_v60 = vand.u32 4294901760, %v198_v57  ;;  %v206_v61 = vand.u32 4294901760, %v205_v59 }
  0x12   :  { %727 = vmatprep.subr.mxu0 %v909_v20  ;;  %738 = vmatprep.subr.mxu1 %v178_v50 }
  0x13   :  { %728 = vmatpush3.msra.mxu0 %v909_v20  ;;  %739 = vmatpush3.msra.mxu1 %v178_v50 }
  0x14   :  { %729 = vmatprep.mubr.f32.mxu0 %v120_v54  ;;  %740 = vmatprep.subr.mxu1 %v185_v55 }
  0x15   :  { %751 = vmatprep.subr.mxu0 %v895_v15  ;;  %730 = vmatmul.mubr.f32.vlgmr.msra.gmra.mxu0 %v130_v56 }
  0x16   :  { %741 = vmatpush3.msra.mxu1 %v185_v55  ;;  %752 = vmatpush3.msra.mxu0 %v895_v15 }
  0x17   :  { %742 = vmatprep.subr.mxu1 %v192_v58  ;;  %753 = vmatprep.subr.mxu0 %v898_v16 }
  0x18   :  { %743 = vmatpush3.msra.mxu1 %v192_v58  ;;  %754 = vmatpush3.msra.mxu0 %v898_v16  ;;  %v25_v16 = vld [vmem:[#allocation2 + $0x8] sm:$0xff] }
  0x19   :  { %744 = vmatprep.subr.mxu1 %v199_v60  ;;  %755 = vmatprep.subr.mxu0 %v903_v18 }
  0x1a   :  { %745 = vmatpush3.msra.mxu1 %v199_v60  ;;  %756 = vmatpush3.msra.mxu0 %v903_v18 }
  0x1b   :  { %746 = vmatprep.subr.mxu1 %v206_v61  ;;  %757 = vmatprep.subr.mxu0 %v912_v21 }
  0x1c   :  { %747 = vmatpush3.msra.mxu1 %v206_v61  ;;  %758 = vmatpush3.msra.mxu0 %v912_v21 }
  0x1d   :  { %749 = vmatmul.mubr.f32.vlgmr.msra.gmra.mxu1 %v932_v29  ;;  %759 = vmatprep.subr.mxu0 %v935_v30 }
  0x1e   :  { %770 = vmatprep.subr.mxu1 %v863_v3  ;;  %760 = vmatpush3.msra.mxu0 %v935_v30 }
  0x1f   :  { %771 = vmatpush3.msra.mxu1 %v863_v3  ;;  %761 = vmatprep.subr.mxu0 %v938_v31 }
  0x20   :  { %772 = vmatprep.subr.mxu1 %v865_v4  ;;  %762 = vmatpush3.msra.mxu0 %v938_v31 }
  0x21   :  { %773 = vmatpush3.msra.mxu1 %v865_v4  ;;  %763 = vmatprep.subr.mxu0 %v196_v47 }
  0x22   :  { %774 = vmatprep.subr.mxu1 %v867_v5  ;;  %764 = vmatpush3.msra.mxu0 %v196_v47 }
  0x23   :  { %775 = vmatpush3.msra.mxu1 %v867_v5  ;;  %765 = vmatprep.subr.mxu0 %v203_v48 }
  0x24   :  { %776 = vmatprep.subr.mxu1 %v878_v9  ;;  %766 = vmatpush3.msra.mxu0 %v203_v48 }
  0x25   :  { %767 = vmatprep.mubr.f32.mxu0 %v948_v35  ;;  %777 = vmatpush3.msra.mxu1 %v878_v9 }
  0x26   :  { %768 = vmatmul.mubr.f32.vlgmr.msra.gmra.mxu0 %v955_v37  ;;  %778 = vmatprep.subr.mxu1 %v880_v10 }
  0x27   :  { %789 = vmatprep.subr.mxu0 %v918_v24  ;;  %779 = vmatpush3.msra.mxu1 %v880_v10 }
  0x28   :  { %790 = vmatpush3.msra.mxu0 %v918_v24  ;;  %780 = vmatprep.subr.mxu1 %v882_v11 }
  0x29   :  { %791 = vmatprep.subr.mxu0 %v921_v25  ;;  %781 = vmatpush3.msra.mxu1 %v882_v11 }
  0x2a   :  { %792 = vmatpush3.msra.mxu0 %v921_v25  ;;  %782 = vmatprep.subr.mxu1 %v900_v17  ;;  %v652_v25 = vld [vmem:[%s1087_s2] ss:$0 sm:$0xff] }
  0x2b   :  { %793 = vmatprep.subr.mxu0 %v924_v26  ;;  %783 = vmatpush3.msra.mxu1 %v900_v17 }
  0x2c   :  { %794 = vmatpush3.msra.mxu0 %v924_v26  ;;  %784 = vmatprep.subr.mxu1 %v909_v20 }
  0x2d   :  { %795 = vmatprep.subr.mxu0 %v930_v28  ;;  %785 = vmatpush3.msra.mxu1 %v909_v20 }
  0x2e   :  { %786 = vmatprep.mubr.f32.mxu1 %v118_v41  ;;  %796 = vmatpush3.msra.mxu0 %v930_v28 }
  0x2f   :  { %787 = vmatmul.mubr.f32.vlgmr.msra.gmra.mxu1 %v128_v43  ;;  %797 = vmatprep.subr.mxu0 %v952_v36 }
  0x30   :  { %808 = vmatprep.subr.mxu1 %v863_v3  ;;  %798 = vmatpush3.msra.mxu0 %v952_v36 }
  0x31   :  { %809 = vmatpush3.msra.mxu1 %v863_v3  ;;  %799 = vmatprep.subr.mxu0 %v967_v44 }
  0x32   :  { %810 = vmatprep.subr.mxu1 %v865_v4  ;;  %800 = vmatpush3.msra.mxu0 %v967_v44 }
  0x33   :  { %811 = vmatpush3.msra.mxu1 %v865_v4  ;;  %801 = vmatprep.subr.mxu0 %v980_v51 }
  0x34   :  { %812 = vmatprep.subr.mxu1 %v867_v5  ;;  %802 = vmatpush3.msra.mxu0 %v980_v51 }
  0x35   :  { %813 = vmatpush3.msra.mxu1 %v867_v5  ;;  %803 = vmatprep.subr.mxu0 %v985_v53 }
  0x36   :  { %814 = vmatprep.subr.mxu1 %v878_v9  ;;  %804 = vmatpush3.msra.mxu0 %v985_v53 }
  0x37   :  { %805 = vmatprep.mubr.f32.mxu0 %v926_v27  ;;  %815 = vmatpush3.msra.mxu1 %v878_v9 }
  0x38   :  { %806 = vmatmul.mubr.f32.vlgmr.msra.gmra.mxu0 %v932_v29  ;;  %816 = vmatprep.subr.mxu1 %v880_v10 }
  0x39   :  { %817 = vmatpush3.msra.mxu1 %v880_v10  ;;  %824 = vmatprep.mubr.f32.mxu1 %v926_v27  ;;  %v643_v27 = vld [vmem:[%s1088_s3 + $0x8] sm:$0xff] }
  0x3a   :  { %818 = vmatprep.subr.mxu1 %v882_v11 }
  0x3b   :  { %819 = vmatpush3.msra.mxu1 %v882_v11 }
  0x3c   :  { %820 = vmatprep.subr.mxu1 %v900_v17 }
  0x3d   :  { %821 = vmatpush3.msra.mxu1 %v900_v17 }
  0x3e   :  { %822 = vmatprep.subr.mxu1 %v909_v20 }
  0x3f   :  { %823 = vmatpush3.msra.mxu1 %v909_v20  ;;  %v24_v20 = vld [vmem:[#allocation2] sm:$0xff] }
  0x40   :  { %825 = vmatmul.mubr.f32.vlgmr.msra.gmra.mxu1 %v932_v29  ;;  %v642_v29 = vld [vmem:[%s1088_s3] sm:$0xff] }
  0xd5   :  { %v731_v63 = vpop.f32.mrf.mxu0 }
  0xd7   :  { %v122_v0 = vpop.f32.mrf.mxu0 }
  0xdd   :  { %v750_v1 = vpop.f32.mrf.mxu1 }
  0xde   :  { %v250_v6 = vadd.f32 %v750_v1, %v731_v63 }
  0xdf   :  { %v243_v3 = vpop.f32.mrf.mxu1 }
  0xe0   :  { %v244_v8 = vadd.f32 %v243_v3, %v122_v0 }
  0xe6   :  { %v769_v2 = vpop.f32.mrf.mxu0 }
  0xe7   :  { %v345_v9 = vadd.f32 %v769_v2, %v250_v6 }
  0xe8   :  { %v337_v4 = vpop.f32.mrf.mxu0 }
  0xe9   :  { %v338_v11 = vadd.f32 %v337_v4, %v244_v8 }
  0xef   :  { %v788_v5 = vpop.f32.mrf.mxu1 }
  0xf0   :  { %v434_v12 = vadd.f32 %v788_v5, %v345_v9 }
  0xf1   :  { %v425_v10 = vpop.f32.mrf.mxu1 }
  0xf2   :  { %v426_v14 = vadd.f32 %v425_v10, %v338_v11 }
  0xf8   :  { %v807_v7 = vpop.f32.mrf.mxu0 }
  0xf9   :  { %v535_v15 = vadd.f32 %v807_v7, %v434_v12 }
  0xfa   :  { %v528_v13 = vpop.f32.mrf.mxu0 }
  0xfb   :  { %v529_v18 = vadd.f32 %v528_v13, %v426_v14 }
 0x100   :  { %v826_v17 = vpop.f32.mrf.mxu1 }
 0x101   :  { %v620_v19 = vadd.f32 %v826_v17, %v535_v15 }
 0x102   :  { %v613_v21 = vpop.f32.mrf.mxu1 }
 0x103   :  { %v624_v22 = vadd.f32 %v620_v19, %v25_v16  ;;  %v614_v23 = vadd.f32 %v613_v21, %v529_v18 }
 0x105   :  { %627 = vst.msk [vmem:[#allocation2 + $0x8] sm:$0xff] %vm21_vm1, %v624_v22  ;;  %v623_v24 = vadd.f32 %v614_v23, %v24_v20 }
 0x107   :  { %626 = vst.msk [vmem:[#allocation2] sm:$0xff] %vm21_vm1, %v623_v24 }
 0x10c   :  { %v632_v26 = vld [vmem:[#allocation2 + $0x8] sm:$0xff] }
 0x10d   :  { %v641_v28 = vadd.f32 %v652_v25, %v632_v26 }
 0x10e   :  { %v631_v30 = vld [vmem:[#allocation2] sm:$0xff] }
 0x10f   :  { %v645_v31 = vadd.f32 %v643_v27, %v641_v28  ;;  %v640_v32 = vadd.f32 %v652_v25, %v631_v30 }
 0x111   :  { %647 = vst.msk [vmem:[%s1089_s4 + $0x8] sm:$0xff] %vm21_vm1, %v645_v31  ;;  %v644_v33 = vadd.f32 %v642_v29, %v640_v32 }
 0x113   :  { %646 = vst.msk [vmem:[%s1089_s4] sm:$0xff] %vm21_vm1, %v644_v33 }

// kernel: encoder_forward.37
= control target key start
LH: loop header
LB: loop body
LE: loop exit
PB: predicated region body
PF: predicated region fallthrough
CT: control target
= control target key end

     0   :  { %vm17_vm0 = vcmask 261120   ;;  %s174_s0 = inlined_call_operand.vmem [shape: f32[16,32], index: 0, kind: input, shape index: {}]   ;;  %s175_s1 = inlined_call_operand.vmem [shape: f32[1,32], index: 1, kind: input, shape index: {}]   ;;  %s176_s2 = inlined_call_operand.vmem [shape: f32[1,32], index: 2, kind: input, shape index: {}]   ;;  %s177_s3 = inlined_call_operand.hbm [shape: f32[16,32], index: 3, kind: output, shape index: {}]  }
   0x1   :  { %v15_v0 = vld [vmem:[%s174_s0] sm:$0xff]  ;;  %v16_v1 = vld [vmem:[%s174_s0 + $0x8] sm:$0xff] }
   0x2   :  { %v18_v2 = vsel %vm17_vm0, %v15_v0, 0.0 }
   0x3   :  { %8 = vsyncpa [#allocation3], 0  ;;  %19 = vadd.xlane.f32.xlu0 %v18_v2  ;;  %v21_v3 = vsel %vm17_vm0, %v16_v1, 0.0  ;;  %v95_v30 = vld [vmem:[%s175_s1] ss:$0 sm:$0xff]  ;;  %s130_s19 = smov [#allocation2]  }
   0x4   :  { %v96_v33 = vld [vmem:[%s176_s2] ss:$0 sm:$0xff]  ;;  %s84_s20 = sshll.u32 %s130_s19, 4  ;;  %s85_s20 = int_to_ptr.vmem [resolvable:$true] %s84_s20 }
   0x5   :  { %s108_s1 = scalar_lea.vmem %s85_s20, 256  ;;  %p113_p1 = scmp.lt.s32.totalorder %s85_s20, %s85_s20 }
   0x6   :  { %p109_p0 = scmp.ne.s32.totalorder %s85_s20, %s108_s1  ;;  %p114_p2 = scmp.lt.s32.totalorder %s108_s1, %s108_s1 }
   0x7   :  { %22 = vadd.xlane.f32.xlu0 %v21_v3 }
   0x8   :  { %p115_p3 = por %p114_p2, %p113_p1 }
   0xa   :  { %p116_p4 = pnand %p115_p3, %p109_p0 }
  0x8c   :  { %v20_v4 = vpop.xlane.xlu0 %19 }
  0x8d   :  { %v25_v5 = vmul.f32 0.03125, %v20_v4 }
  0x8f   :  { %v27_v6 = vsub.f32 %v15_v0, %v25_v5 }
  0x90   :  { %v23_v7 = vpop.xlane.xlu0 %22 }
  0x91   :  { %v26_v8 = vmul.f32 0.03125, %v23_v7  ;;  %v29_v9 = vmul.f32 %v27_v6, %v27_v6  ;;  %v46_v31 = vmul.f32 %v95_v30, %v27_v6 }
  0x93   :  { %v28_v10 = vsub.f32 %v16_v1, %v26_v8  ;;  %v31_v11 = vsel %vm17_vm0, %v29_v9, 0.0 }
  0x94   :  { %32 = vadd.xlane.f32.xlu1 %v31_v11 }
  0x95   :  { %v30_v12 = vmul.f32 %v28_v10, %v28_v10  ;;  %v47_v35 = vmul.f32 %v95_v30, %v28_v10 }
  0x97   :  { %v34_v13 = vsel %vm17_vm0, %v30_v12, 0.0 }
  0x98   :  { %35 = vadd.xlane.f32.xlu1 %v34_v13 }
 0x11d   :  { %v33_v14 = vpop.xlane.xlu1 %32 }
 0x11e   :  { %v37_v15 = vmul.f32 0.032258064, %v33_v14 }
 0x120   :  { %100 = vrsqrt.f32 %v37_v15  ;;  %vm50_vm1 = vcmp.eq.f32.partialorder %v37_v15, inf  ;;  %v53_v20 = vand.u32 2147483648, %v37_v15  ;;  %vm52_vm2 = vcmp.eq.f32.partialorder %v37_v15, 0.0 }
 0x121   :  { %v36_v16 = vpop.xlane.xlu1 %35 }
 0x122   :  { %v38_v17 = vmul.f32 0.032258064, %v36_v16 }
 0x124   :  { %102 = vrsqrt.f32 %v38_v17  ;;  %vm57_vm3 = vcmp.eq.f32.partialorder %v38_v17, inf  ;;  %v60_v26 = vand.u32 2147483648, %v38_v17  ;;  %vm59_vm4 = vcmp.eq.f32.partialorder %v38_v17, 0.0 }
 0x12d   :  { %v101_v18 = vpop.eup %100 }
 0x12e   :  { %v49_v19 = vmul.f32 %v101_v18, %v37_v15 }
 0x130   :  { %v51_v21 = vsel %vm50_vm1, %v37_v15, %v49_v19 }
 0x131   :  { %v103_v22 = vpop.eup %102  ;;  %v54_v23 = vsel %vm52_vm2, %v53_v20, %v51_v21 }
 0x132   :  { %v62_v24 = vadd.f32 1e-06, %v54_v23  ;;  %v56_v25 = vmul.f32 %v103_v22, %v38_v17 }
 0x134   :  { %104 = vrcp.f32 %v62_v24  ;;  %v58_v27 = vsel %vm57_vm3, %v38_v17, %v56_v25 }
 0x135   :  { %v61_v28 = vsel %vm59_vm4, %v60_v26, %v58_v27 }
 0x136   :  { %v63_v29 = vadd.f32 1e-06, %v61_v28 }
 0x138   :  { %106 = vrcp.f32 %v63_v29 }
 0x141   :  { %v105_v32 = vpop.eup %104 }
 0x142   :  { %v65_v34 = vmul.f32 %v105_v32, %v46_v31 }
 0x144   :  { %v75_v36 = vadd.f32 %v96_v33, %v65_v34 }
 0x145   :  { %v107_v37 = vpop.eup %106 }
 0x146   :  { %v67_v38 = vmul.f32 %v107_v37, %v47_v35  ;;  %77 = vst.msk [vmem:[#allocation2] sm:$0xff] %vm17_vm0, %v75_v36 }
 0x148   :  { %v76_v39 = vadd.f32 %v96_v33, %v67_v38 }
 0x14a   :  { %78 = vst.msk [vmem:[#allocation2 + $0x8] sm:$0xff] %vm17_vm0, %v76_v39 }
 0x14b   :  { %119 = shalt.err (!%p116_p4)
}
 0x14c   :  { %s131_s2 = smov 128   ;;  %s132_s21 = smov 8  }
 0x14d   :  { %90 = dma.vmem_to_hbm [thread:$0]  %s85_s20, 256, %s177_s3, [#allocation3], %s131_s2, %s131_s2, %s132_s21  }
 0x14e   :  { %128 = dma.done.wait [#allocation3], 256  }
 0x14f   :  { %129 = vsyncadd [#allocation3], 4294967040 }
 0x150   :  { %94 = vsyncpa [#allocation3], 1 }

</bundles_post_ra>
